<compile_context>
chip_gen: v7x
topology: tpu7x:2x2x1
jax: 0.10.0
libtpu: 0.0.40
codegen_flags: <defaults>
</compile_context>

<pallas_src>
import functools

import jax
import jax.numpy as jnp
from jax.experimental import pallas as pl
from jax.experimental.pallas import tpu as pltpu

BN_EPS = 1e-5


def _round_up(x, m):
    return (x + m - 1) // m * m


def _hw_budget():
    """(row_tile_target, vmem_limit_bytes), sized per TPU generation."""
    try:
        kind = jax.devices()[0].device_kind.lower()
    except Exception:
        kind = ""
    big_vmem = any(t in kind for t in ("v5 lite", "v5e", "v6 lite", "v6e"))
    if big_vmem:                          # v5e / v6e: 128 MiB VMEM per TensorCore
        return 2048, 96 * 1024 * 1024
    return 1024, 48 * 1024 * 1024         # v7x (64 MiB / TC) and unknown: safe


_ROW_TILE_TARGET, _VMEM_LIMIT = _hw_budget()


def _tile(s, target=_ROW_TILE_TARGET):
    """Row-tile size: multiple of 16 (bf16 sublane packing), ~target rows."""
    n_tiles = max(1, -(-s // target))
    ts = _round_up(-(-s // n_tiles), 16)
    return ts, ts * n_tiles


_SQRT_2_OVER_PI = 0.7978845608028654


def _gelu(x):
    # TODO(synk): PyTorch nn.GELU() default is exact erf; tanh-approx is used per the
    # perf review (transcendental moves to the EUP slot; max abs error ~1e-3).
    return 0.5 * x * (1.0 + jnp.tanh(_SQRT_2_OVER_PI * (x + 0.044715 * x * x * x)))


# ---------------------------------------------------------------------------
# Pass 1: stats only (per-tile per-channel sum / sum-of-squares of conv output)
# ---------------------------------------------------------------------------
def _matmul_stats_kernel(p_ref, w_ref, sum_ref, ssq_ref):
    # p_ref: (TS, K) bf16 ; w_ref: (K, Npad) bf16
    y = jnp.dot(p_ref[...], w_ref[...], preferred_element_type=jnp.float32)
    sum_ref[...] = jnp.sum(y, axis=0, keepdims=True)       # (1, Npad)
    ssq_ref[...] = jnp.sum(y * y, axis=0, keepdims=True)   # (1, Npad)


# ---------------------------------------------------------------------------
# Pass 2: recompute matmul + BN affine + GELU (+ position embedding), one write
# ---------------------------------------------------------------------------
def _matmul_bn_gelu_kernel(p_ref, w_ref, scale_ref, shift_ref, o_ref):
    y = jnp.dot(p_ref[...], w_ref[...], preferred_element_type=jnp.float32)
    o_ref[...] = _gelu(y * scale_ref[...] + shift_ref[...]).astype(o_ref.dtype)


def _matmul_bn_gelu_pos_kernel(p_ref, w_ref, scale_ref, shift_ref, pos_ref, o_ref):
    y = jnp.dot(p_ref[...], w_ref[...], preferred_element_type=jnp.float32)
    z = _gelu(y * scale_ref[...] + shift_ref[...]) + pos_ref[...]
    o_ref[...] = z.astype(o_ref.dtype)


def _conv_bn_gelu_stage(rows, w, gamma, beta, count, *, ts, out_dtype,
                        pos=None, ns=None):
    """One Conv2d(bias=False) + BatchNorm2d(batch stats) + GELU stage on im2col rows.

    rows: (R, K) bf16, R = B * S_pad flattened batch-major; padded rows are zero
          (so they contribute nothing to the BN statistics); R % ts == 0.
    w:    (K, Npad) bf16 ; gamma/beta: (Npad,) f32 ; count = B * S (real rows).
    pos:  optional (S_pad, Npad) f32 table added after GELU (ns = S_pad // ts).
    """
    R, K = rows.shape
    Npad = w.shape[1]
    nt = R // ts
    cparams = pltpu.CompilerParams(
        dimension_semantics=("parallel",), vmem_limit_bytes=_VMEM_LIMIT)

    # ---- pass 1: per-tile BN partial statistics (no activation written) ----
    sums, ssqs = pl.pallas_call(
        _matmul_stats_kernel,
        out_shape=(jax.ShapeDtypeStruct((nt, 1, Npad), jnp.float32),
                   jax.ShapeDtypeStruct((nt, 1, Npad), jnp.float32)),
        grid=(nt,),
        in_specs=[pl.BlockSpec((ts, K), lambda i: (i, 0)),
                  pl.BlockSpec((K, Npad), lambda i: (0, 0))],
        out_specs=(pl.BlockSpec((None, 1, Npad), lambda i: (i, 0, 0)),
                   pl.BlockSpec((None, 1, Npad), lambda i: (i, 0, 0))),
        compiler_params=cparams,
    )(rows, w)

    # ---- tiny XLA reduction: partials -> per-channel scale / shift ----
    total = jnp.sum(sums, axis=(0, 1))
    total_sq = jnp.sum(ssqs, axis=(0, 1))
    mean = total / count
    var = jnp.maximum(total_sq / count - mean * mean, 0.0)   # biased (training-mode BN)
    g_inv = gamma * jax.lax.rsqrt(var + BN_EPS)
    scale = g_inv[None, :]
    shift = (beta - mean * g_inv)[None, :]

    # ---- pass 2: recompute matmul, normalize, GELU (+ pos), single write ----
    in_specs = [
        pl.BlockSpec((ts, K), lambda i: (i, 0)),
        pl.BlockSpec((K, Npad), lambda i: (0, 0)),
        pl.BlockSpec((1, Npad), lambda i: (0, 0)),
        pl.BlockSpec((1, Npad), lambda i: (0, 0)),
    ]
    args = [rows, w, scale, shift]
    kernel = _matmul_bn_gelu_kernel
    if pos is not None:
        # Broadcast over batch purely through the index_map (rows are batch-major).
        in_specs.append(pl.BlockSpec((ts, Npad), lambda i, ns=ns: (i % ns, 0)))
        args.append(pos)
        kernel = _matmul_bn_gelu_pos_kernel

    return pl.pallas_call(
        kernel,
        out_shape=jax.ShapeDtypeStruct((R, Npad), out_dtype),
        grid=(nt,),
        in_specs=in_specs,
        out_specs=pl.BlockSpec((ts, Npad), lambda i: (i, 0)),
        compiler_params=cparams,
    )(*args)


# ---------------------------------------------------------------------------
# Plain-JAX glue: im2col (NHWC, valid padding, PyTorch conv semantics)
# ---------------------------------------------------------------------------
def _im2col_nhwc(x, kh, kw, sh, sw):
    """x: (B, H, W, C) -> (B, Ho*Wo, kh*kw*C); column order (kh, kw, c), c fastest."""
    B, H, W, C = x.shape
    Ho = (H - kh) // sh + 1
    Wo = (W - kw) // sw + 1
    cols = []
    for i in range(kh):
        for j in range(kw):
            cols.append(
                x[:, i:i + sh * (Ho - 1) + 1:sh, j:j + sw * (Wo - 1) + 1:sw, :]
            )
    p = jnp.stack(cols, axis=3)                     # (B, Ho, Wo, kh*kw, C)
    return p.reshape(B, Ho * Wo, kh * kw * C), Ho, Wo


def _pad_rows_flatten(p, s_pad):
    """(B, S, K) -> zero-pad S to s_pad, flatten batch-major to (B*s_pad, K) bf16."""
    B, S, K = p.shape
    if s_pad != S:
        p = jnp.pad(p, ((0, 0), (0, s_pad - S), (0, 0)))
    return p.astype(jnp.bfloat16).reshape(B * s_pad, K)


def _prep_weight(w_oihw, n_pad):
    """PyTorch OIHW -> (KH*KW*I, O) matching the im2col column order; pad O; bf16."""
    O, I, KH, KW = w_oihw.shape
    wm = jnp.transpose(w_oihw, (2, 3, 1, 0)).reshape(KH * KW * I, O)
    wm = jnp.pad(wm, ((0, 0), (0, n_pad - O)))
    return wm.astype(jnp.bfloat16)


def prepare_params(params, image_hw, *, hidden_size, max_position_ids):
    """One-time (per config) parameter prep outside the hot jitted forward."""
    H, W = image_hw
    hid = hidden_size
    n_pad = _round_up(hid, 128)
    H1, W1 = (H - 3) // 2 + 1, W
    H2, W2 = (H1 - 3) // 2 + 1, (W1 - 3) // 2 + 1
    prep = {
        "w1": _prep_weight(params["w1"], n_pad),
        "w2": _prep_weight(params["w2"], n_pad),
        "gamma1": jnp.pad(params["gamma1"], (0, n_pad - hid)),
        "beta1": jnp.pad(params["beta1"], (0, n_pad - hid)),
        "gamma2": jnp.pad(params["gamma2"], (0, n_pad - hid)),
        "beta2": jnp.pad(params["beta2"], (0, n_pad - hid)),
    }
    if max_position_ids > 0:
        # TODO(synk): torchvision TF.resize (bilinear, antialias) approximated with
        # jax.image.resize; not guaranteed bit-exact to torchvision's filter.
        pos = jax.image.resize(
            params["pos"], (hid, H2, W2), method="linear", antialias=True
        )
        prep["pos_rows"] = jnp.transpose(pos, (1, 2, 0)).reshape(H2 * W2, hid)
    return prep


# ---------------------------------------------------------------------------
# Forward
# ---------------------------------------------------------------------------
@functools.partial(jax.jit, static_argnames=("hidden_size",))
def fvtr_embedding_forward(image, prep, *, hidden_size):
    """FVTREmbedding.forward. image: NCHW f32 -> (B, hidden, H2, W2) f32."""
    B, C, H, W = image.shape
    hid = hidden_size
    n_pad = _round_up(hid, 128)

    x0 = jnp.transpose(image, (0, 2, 3, 1))  # single NCHW -> NHWC transpose

    # ---- conv1: Conv2d(C, hid, k=(3,1), s=(2,1), bias=False) + BN + GELU ----
    p1, H1, W1 = _im2col_nhwc(x0, 3, 1, 2, 1)
    S1 = H1 * W1
    ts1, S1p = _tile(S1)
    rows1 = _pad_rows_flatten(p1, S1p)                        # (B*S1p, 3*C) bf16
    a1 = _conv_bn_gelu_stage(
        rows1, prep["w1"], prep["gamma1"], prep["beta1"], count=B * S1,
        ts=ts1, out_dtype=jnp.bfloat16)                       # (B*S1p, n_pad) bf16
    x1 = a1.reshape(B, S1p, n_pad)[:, :S1, :hid].reshape(B, H1, W1, hid)

    # ---- conv2: Conv2d(hid, hid, k=3, s=2, bias=False) + BN + GELU (+ pos) ----
    p2, H2, W2 = _im2col_nhwc(x1, 3, 3, 2, 2)
    S2 = H2 * W2
    ts2, S2p = _tile(S2)
    rows2 = _pad_rows_flatten(p2, S2p)                        # (B*S2p, 9*hid) bf16
    ns2 = S2p // ts2
    pos = None
    if "pos_rows" in prep:
        pos = jnp.pad(prep["pos_rows"],
                      ((0, S2p - S2), (0, n_pad - hid)))      # (S2p, n_pad) f32
    a2 = _conv_bn_gelu_stage(
        rows2, prep["w2"], prep["gamma2"], prep["beta2"], count=B * S2,
        ts=ts2, out_dtype=jnp.float32, pos=pos, ns=ns2)       # (B*S2p, n_pad) f32

    out = a2.reshape(B, S2p, n_pad)[:, :S2, :hid].reshape(B, H2, W2, hid)
    return jnp.transpose(out, (0, 3, 1, 2))  # NCHW like the PyTorch module


def init_params(key, hidden_size, image_channel, max_position_ids):
    k1, k2, k3 = jax.random.split(key, 3)
    fan1 = image_channel * 3 * 1
    fan2 = hidden_size * 3 * 3
    return {
        # Conv weights in PyTorch OIHW layout.
        "w1": jax.random.uniform(
            k1, (hidden_size, image_channel, 3, 1), jnp.float32,
            minval=-1.0, maxval=1.0) * (fan1 ** -0.5),
        "w2": jax.random.uniform(
            k2, (hidden_size, hidden_size, 3, 3), jnp.float32,
            minval=-1.0, maxval=1.0) * (fan2 ** -0.5),
        # BatchNorm affine params (PyTorch init: gamma=1, beta=0).
        "gamma1": jnp.ones((hidden_size,), jnp.float32),
        "beta1": jnp.zeros((hidden_size,), jnp.float32),
        "gamma2": jnp.ones((hidden_size,), jnp.float32),
        "beta2": jnp.zeros((hidden_size,), jnp.float32),
        # PositionEmbedding buffer: torch.rand -> uniform [0, 1).
        "pos": jax.random.uniform(
            k3, (hidden_size, max_position_ids, max_position_ids), jnp.float32),
    }


if __name__ == "__main__":
    hidden_size = 32
    image_channel = 3
    max_position_ids = 64
    B, H, W = 2, 16, 32

    root = jax.random.PRNGKey(0)
    kp, kx = jax.random.split(root)
    params = init_params(kp, hidden_size, image_channel, max_position_ids)
    image = jax.random.normal(kx, (B, image_channel, H, W), jnp.float32)

    prep = prepare_params(
        params, (H, W), hidden_size=hidden_size, max_position_ids=max_position_ids
    )
    out = fvtr_embedding_forward(image, prep, hidden_size=hidden_size)
    out = jax.block_until_ready(out)

    # Expected spatial: H1=(16-3)//2+1=7, W1=32 ; H2=(7-3)//2+1=3, W2=(32-3)//2+1=15
    assert out.shape == (B, hidden_size, 3, 15), out.shape
    assert bool(jnp.all(jnp.isfinite(out)))
    print("KERNEL_OK")
</pallas_src>

<mosaic_0001>
module attributes {stable_mosaic.version = 11 : i64} {
  func.func @_matmul_stats_kernel(%arg0: i32, %arg1: memref<224x9xbf16, #tpu.memory_space<vmem>>, %arg2: memref<9x128xbf16, #tpu.memory_space<vmem>>, %arg3: memref<1x1x128xf32, #tpu.memory_space<vmem>>, %arg4: memref<1x1x128xf32, #tpu.memory_space<vmem>>) attributes {dimension_semantics = [#tpu.dimension_semantics<parallel>], iteration_bounds = array<i64: 2>, scalar_prefetch = 0 : i64, scratch_operands = 0 : i64, tpu.core_type = #tpu.core_type<tc>, window_params = [{transform_indices = @transform_0, window_bounds = array<i64: 224, 9>}, {pipeline_mode = #tpu.pipeline_mode<synchronous>, transform_indices = @transform_1, window_bounds = array<i64: 9, 128>}, {transform_indices = @transform_2, window_bounds = array<i64: 1, 1, 128>}, {transform_indices = @transform_3, window_bounds = array<i64: 1, 1, 128>}]} {
    %c0 = arith.constant 0 : index
    %c0_0 = arith.constant 0 : index
    %0 = vector.load %arg1[%c0, %c0_0] : memref<224x9xbf16, #tpu.memory_space<vmem>>, vector<224x9xbf16>
    %c0_1 = arith.constant 0 : index
    %c0_2 = arith.constant 0 : index
    %1 = vector.load %arg2[%c0_1, %c0_2] : memref<9x128xbf16, #tpu.memory_space<vmem>>, vector<9x128xbf16>
    %cst = arith.constant dense<0.000000e+00> : vector<224x128xf32>
    %2 = tpu.matmul %0, %1, %cst {dimension_numbers = #tpu.dot_dimension_numbers<[1], [0], [0], [1], [0, 0, 1, 1], [], []>} : vector<224x9xbf16>, vector<9x128xbf16>, vector<224x128xf32> -> vector<224x128xf32>
    %cst_3 = arith.constant dense<0.000000e+00> : vector<128xf32>
    %3 = vector.multi_reduction <add>, %2, %cst_3 [0] : vector<224x128xf32> to vector<128xf32>
    %4 = vector.shape_cast %3 : vector<128xf32> to vector<1x128xf32>
    %c0_4 = arith.constant 0 : index
    %c0_5 = arith.constant 0 : index
    %c0_6 = arith.constant 0 : index
    %5 = vector.load %arg3[%c0_4, %c0_5, %c0_6] : memref<1x1x128xf32, #tpu.memory_space<vmem>>, vector<1x1x128xf32>
    %6 = vector.shape_cast %5 : vector<1x1x128xf32> to vector<1x128xf32>
    %7 = vector.shape_cast %4 : vector<1x128xf32> to vector<1x1x128xf32>
    tpu.vector_store %arg3[%c0_4, %c0_5, %c0_6], %7 {strides = array<i32>} : memref<1x1x128xf32, #tpu.memory_space<vmem>>, vector<1x1x128xf32>,
    %8 = arith.mulf %2, %2 : vector<224x128xf32>
    %cst_7 = arith.constant dense<0.000000e+00> : vector<128xf32>
    %9 = vector.multi_reduction <add>, %8, %cst_7 [0] : vector<224x128xf32> to vector<128xf32>
    %10 = vector.shape_cast %9 : vector<128xf32> to vector<1x128xf32>
    %c0_8 = arith.constant 0 : index
    %c0_9 = arith.constant 0 : index
    %c0_10 = arith.constant 0 : index
    %11 = vector.load %arg4[%c0_8, %c0_9, %c0_10] : memref<1x1x128xf32, #tpu.memory_space<vmem>>, vector<1x1x128xf32>
    %12 = vector.shape_cast %11 : vector<1x1x128xf32> to vector<1x128xf32>
    %13 = vector.shape_cast %10 : vector<1x128xf32> to vector<1x1x128xf32>
    tpu.vector_store %arg4[%c0_8, %c0_9, %c0_10], %13 {strides = array<i32>} : memref<1x1x128xf32, #tpu.memory_space<vmem>>, vector<1x1x128xf32>,
    return
  }
  func.func @transform_0(%arg0: i32) -> (i32, i32) {
    %c0_i32 = arith.constant 0 : i32
    %c0_i32_0 = arith.constant 0 : i32
    return %arg0, %c0_i32 : i32, i32
  }
  func.func @transform_1(%arg0: i32) -> (i32, i32) {
    %c0_i32 = arith.constant 0 : i32
    %c0_i32_0 = arith.constant 0 : i32
    %c0_i32_1 = arith.constant 0 : i32
    return %c0_i32, %c0_i32_0 : i32, i32
  }
  func.func @transform_2(%arg0: i32) -> (i32, i32, i32) {
    %c0_i32 = arith.constant 0 : i32
    %c0_i32_0 = arith.constant 0 : i32
    %c0_i32_1 = arith.constant 0 : i32
    return %arg0, %c0_i32, %c0_i32_0 : i32, i32, i32
  }
  func.func @transform_3(%arg0: i32) -> (i32, i32, i32) {
    %c0_i32 = arith.constant 0 : i32
    %c0_i32_0 = arith.constant 0 : i32
    %c0_i32_1 = arith.constant 0 : i32
    return %arg0, %c0_i32, %c0_i32_0 : i32, i32, i32
  }
}

module attributes {stable_mosaic.version = 11 : i64} {
  func.func @_matmul_bn_gelu_kernel(%arg0: i32, %arg1: memref<224x9xbf16, #tpu.memory_space<vmem>>, %arg2: memref<9x128xbf16, #tpu.memory_space<vmem>>, %arg3: memref<1x128xf32, #tpu.memory_space<vmem>>, %arg4: memref<1x128xf32, #tpu.memory_space<vmem>>, %arg5: memref<224x128xbf16, #tpu.memory_space<vmem>>) attributes {dimension_semantics = [#tpu.dimension_semantics<parallel>], iteration_bounds = array<i64: 2>, scalar_prefetch = 0 : i64, scratch_operands = 0 : i64, tpu.core_type = #tpu.core_type<tc>, window_params = [{transform_indices = @transform_0, window_bounds = array<i64: 224, 9>}, {pipeline_mode = #tpu.pipeline_mode<synchronous>, transform_indices = @transform_1, window_bounds = array<i64: 9, 128>}, {pipeline_mode = #tpu.pipeline_mode<synchronous>, transform_indices = @transform_2, window_bounds = array<i64: 1, 128>}, {pipeline_mode = #tpu.pipeline_mode<synchronous>, transform_indices = @transform_3, window_bounds = array<i64: 1, 128>}, {transform_indices = @transform_4, window_bounds = array<i64: 224, 128>}]} {
    %c0 = arith.constant 0 : index
    %c0_0 = arith.constant 0 : index
    %0 = vector.load %arg1[%c0, %c0_0] : memref<224x9xbf16, #tpu.memory_space<vmem>>, vector<224x9xbf16>
    %c0_1 = arith.constant 0 : index
    %c0_2 = arith.constant 0 : index
    %1 = vector.load %arg2[%c0_1, %c0_2] : memref<9x128xbf16, #tpu.memory_space<vmem>>, vector<9x128xbf16>
    %cst = arith.constant dense<0.000000e+00> : vector<224x128xf32>
    %2 = tpu.matmul %0, %1, %cst {dimension_numbers = #tpu.dot_dimension_numbers<[1], [0], [0], [1], [0, 0, 1, 1], [], []>} : vector<224x9xbf16>, vector<9x128xbf16>, vector<224x128xf32> -> vector<224x128xf32>
    %c0_3 = arith.constant 0 : index
    %c0_4 = arith.constant 0 : index
    %3 = vector.load %arg3[%c0_3, %c0_4] : memref<1x128xf32, #tpu.memory_space<vmem>>, vector<1x128xf32>
    %4 = vector.broadcast %3 : vector<1x128xf32> to vector<224x128xf32>
    %5 = arith.mulf %2, %4 : vector<224x128xf32>
    %c0_5 = arith.constant 0 : index
    %c0_6 = arith.constant 0 : index
    %6 = vector.load %arg4[%c0_5, %c0_6] : memref<1x128xf32, #tpu.memory_space<vmem>>, vector<1x128xf32>
    %7 = vector.broadcast %6 : vector<1x128xf32> to vector<224x128xf32>
    %8 = arith.addf %5, %7 : vector<224x128xf32>
    %cst_7 = arith.constant 5.000000e-01 : f32
    %9 = vector.broadcast %cst_7 : f32 to vector<224x128xf32>
    %10 = arith.mulf %9, %8 : vector<224x128xf32>
    %cst_8 = arith.constant 4.471500e-02 : f32
    %11 = vector.broadcast %cst_8 : f32 to vector<224x128xf32>
    %12 = arith.mulf %11, %8 : vector<224x128xf32>
    %13 = arith.mulf %12, %8 : vector<224x128xf32>
    %14 = arith.mulf %13, %8 : vector<224x128xf32>
    %15 = arith.addf %8, %14 : vector<224x128xf32>
    %cst_9 = arith.constant 0.797884583 : f32
    %16 = vector.broadcast %cst_9 : f32 to vector<224x128xf32>
    %17 = arith.mulf %16, %15 : vector<224x128xf32>
    %18 = math.tanh %17 : vector<224x128xf32>
    %cst_10 = arith.constant 1.000000e+00 : f32
    %19 = vector.broadcast %cst_10 : f32 to vector<224x128xf32>
    %20 = arith.addf %19, %18 : vector<224x128xf32>
    %21 = arith.mulf %10, %20 : vector<224x128xf32>
    %22 = arith.truncf %21 : vector<224x128xf32> to vector<224x128xbf16>
    %c0_11 = arith.constant 0 : index
    %c0_12 = arith.constant 0 : index
    %23 = vector.load %arg5[%c0_11, %c0_12] : memref<224x128xbf16, #tpu.memory_space<vmem>>, vector<224x128xbf16>
    tpu.vector_store %arg5[%c0_11, %c0_12], %22 {strides = array<i32>} : memref<224x128xbf16, #tpu.memory_space<vmem>>, vector<224x128xbf16>,
    return
  }
  func.func @transform_0(%arg0: i32) -> (i32, i32) {
    %c0_i32 = arith.constant 0 : i32
    %c0_i32_0 = arith.constant 0 : i32
    return %arg0, %c0_i32 : i32, i32
  }
  func.func @transform_1(%arg0: i32) -> (i32, i32) {
    %c0_i32 = arith.constant 0 : i32
    %c0_i32_0 = arith.constant 0 : i32
    %c0_i32_1 = arith.constant 0 : i32
    return %c0_i32, %c0_i32_0 : i32, i32
  }
  func.func @transform_2(%arg0: i32) -> (i32, i32) {
    %c0_i32 = arith.constant 0 : i32
    %c0_i32_0 = arith.constant 0 : i32
    %c0_i32_1 = arith.constant 0 : i32
    return %c0_i32, %c0_i32_0 : i32, i32
  }
  func.func @transform_3(%arg0: i32) -> (i32, i32) {
    %c0_i32 = arith.constant 0 : i32
    %c0_i32_0 = arith.constant 0 : i32
    %c0_i32_1 = arith.constant 0 : i32
    return %c0_i32, %c0_i32_0 : i32, i32
  }
  func.func @transform_4(%arg0: i32) -> (i32, i32) {
    %c0_i32 = arith.constant 0 : i32
    %c0_i32_0 = arith.constant 0 : i32
    return %arg0, %c0_i32 : i32, i32
  }
}

module attributes {stable_mosaic.version = 11 : i64} {
  func.func @_matmul_stats_kernel(%arg0: i32, %arg1: memref<48x288xbf16, #tpu.memory_space<vmem>>, %arg2: memref<288x128xbf16, #tpu.memory_space<vmem>>, %arg3: memref<1x1x128xf32, #tpu.memory_space<vmem>>, %arg4: memref<1x1x128xf32, #tpu.memory_space<vmem>>) attributes {dimension_semantics = [#tpu.dimension_semantics<parallel>], iteration_bounds = array<i64: 2>, scalar_prefetch = 0 : i64, scratch_operands = 0 : i64, tpu.core_type = #tpu.core_type<tc>, window_params = [{transform_indices = @transform_0, window_bounds = array<i64: 48, 288>}, {pipeline_mode = #tpu.pipeline_mode<synchronous>, transform_indices = @transform_1, window_bounds = array<i64: 288, 128>}, {transform_indices = @transform_2, window_bounds = array<i64: 1, 1, 128>}, {transform_indices = @transform_3, window_bounds = array<i64: 1, 1, 128>}]} {
    %c0 = arith.constant 0 : index
    %c0_0 = arith.constant 0 : index
    %0 = vector.load %arg1[%c0, %c0_0] : memref<48x288xbf16, #tpu.memory_space<vmem>>, vector<48x288xbf16>
    %c0_1 = arith.constant 0 : index
    %c0_2 = arith.constant 0 : index
    %1 = vector.load %arg2[%c0_1, %c0_2] : memref<288x128xbf16, #tpu.memory_space<vmem>>, vector<288x128xbf16>
    %cst = arith.constant dense<0.000000e+00> : vector<48x128xf32>
    %2 = tpu.matmul %0, %1, %cst {dimension_numbers = #tpu.dot_dimension_numbers<[1], [0], [0], [1], [0, 0, 1, 1], [], []>} : vector<48x288xbf16>, vector<288x128xbf16>, vector<48x128xf32> -> vector<48x128xf32>
    %cst_3 = arith.constant dense<0.000000e+00> : vector<128xf32>
    %3 = vector.multi_reduction <add>, %2, %cst_3 [0] : vector<48x128xf32> to vector<128xf32>
    %4 = vector.shape_cast %3 : vector<128xf32> to vector<1x128xf32>
    %c0_4 = arith.constant 0 : index
    %c0_5 = arith.constant 0 : index
    %c0_6 = arith.constant 0 : index
    %5 = vector.load %arg3[%c0_4, %c0_5, %c0_6] : memref<1x1x128xf32, #tpu.memory_space<vmem>>, vector<1x1x128xf32>
    %6 = vector.shape_cast %5 : vector<1x1x128xf32> to vector<1x128xf32>
    %7 = vector.shape_cast %4 : vector<1x128xf32> to vector<1x1x128xf32>
    tpu.vector_store %arg3[%c0_4, %c0_5, %c0_6], %7 {strides = array<i32>} : memref<1x1x128xf32, #tpu.memory_space<vmem>>, vector<1x1x128xf32>,
    %8 = arith.mulf %2, %2 : vector<48x128xf32>
    %cst_7 = arith.constant dense<0.000000e+00> : vector<128xf32>
    %9 = vector.multi_reduction <add>, %8, %cst_7 [0] : vector<48x128xf32> to vector<128xf32>
    %10 = vector.shape_cast %9 : vector<128xf32> to vector<1x128xf32>
    %c0_8 = arith.constant 0 : index
    %c0_9 = arith.constant 0 : index
    %c0_10 = arith.constant 0 : index
    %11 = vector.load %arg4[%c0_8, %c0_9, %c0_10] : memref<1x1x128xf32, #tpu.memory_space<vmem>>, vector<1x1x128xf32>
    %12 = vector.shape_cast %11 : vector<1x1x128xf32> to vector<1x128xf32>
    %13 = vector.shape_cast %10 : vector<1x128xf32> to vector<1x1x128xf32>
    tpu.vector_store %arg4[%c0_8, %c0_9, %c0_10], %13 {strides = array<i32>} : memref<1x1x128xf32, #tpu.memory_space<vmem>>, vector<1x1x128xf32>,
    return
  }
  func.func @transform_0(%arg0: i32) -> (i32, i32) {
    %c0_i32 = arith.constant 0 : i32
    %c0_i32_0 = arith.constant 0 : i32
    return %arg0, %c0_i32 : i32, i32
  }
  func.func @transform_1(%arg0: i32) -> (i32, i32) {
    %c0_i32 = arith.constant 0 : i32
    %c0_i32_0 = arith.constant 0 : i32
    %c0_i32_1 = arith.constant 0 : i32
    return %c0_i32, %c0_i32_0 : i32, i32
  }
  func.func @transform_2(%arg0: i32) -> (i32, i32, i32) {
    %c0_i32 = arith.constant 0 : i32
    %c0_i32_0 = arith.constant 0 : i32
    %c0_i32_1 = arith.constant 0 : i32
    return %arg0, %c0_i32, %c0_i32_0 : i32, i32, i32
  }
  func.func @transform_3(%arg0: i32) -> (i32, i32, i32) {
    %c0_i32 = arith.constant 0 : i32
    %c0_i32_0 = arith.constant 0 : i32
    %c0_i32_1 = arith.constant 0 : i32
    return %arg0, %c0_i32, %c0_i32_0 : i32, i32, i32
  }
}

module attributes {stable_mosaic.version = 11 : i64} {
  func.func @_matmul_bn_gelu_pos_kernel(%arg0: i32, %arg1: memref<48x288xbf16, #tpu.memory_space<vmem>>, %arg2: memref<288x128xbf16, #tpu.memory_space<vmem>>, %arg3: memref<1x128xf32, #tpu.memory_space<vmem>>, %arg4: memref<1x128xf32, #tpu.memory_space<vmem>>, %arg5: memref<48x128xf32, #tpu.memory_space<vmem>>, %arg6: memref<48x128xf32, #tpu.memory_space<vmem>>) attributes {dimension_semantics = [#tpu.dimension_semantics<parallel>], iteration_bounds = array<i64: 2>, scalar_prefetch = 0 : i64, scratch_operands = 0 : i64, tpu.core_type = #tpu.core_type<tc>, window_params = [{transform_indices = @transform_0, window_bounds = array<i64: 48, 288>}, {pipeline_mode = #tpu.pipeline_mode<synchronous>, transform_indices = @transform_1, window_bounds = array<i64: 288, 128>}, {pipeline_mode = #tpu.pipeline_mode<synchronous>, transform_indices = @transform_2, window_bounds = array<i64: 1, 128>}, {pipeline_mode = #tpu.pipeline_mode<synchronous>, transform_indices = @transform_3, window_bounds = array<i64: 1, 128>}, {transform_indices = @transform_4, window_bounds = array<i64: 48, 128>}, {transform_indices = @transform_5, window_bounds = array<i64: 48, 128>}]} {
    %c0 = arith.constant 0 : index
    %c0_0 = arith.constant 0 : index
    %0 = vector.load %arg1[%c0, %c0_0] : memref<48x288xbf16, #tpu.memory_space<vmem>>, vector<48x288xbf16>
    %c0_1 = arith.constant 0 : index
    %c0_2 = arith.constant 0 : index
    %1 = vector.load %arg2[%c0_1, %c0_2] : memref<288x128xbf16, #tpu.memory_space<vmem>>, vector<288x128xbf16>
    %cst = arith.constant dense<0.000000e+00> : vector<48x128xf32>
    %2 = tpu.matmul %0, %1, %cst {dimension_numbers = #tpu.dot_dimension_numbers<[1], [0], [0], [1], [0, 0, 1, 1], [], []>} : vector<48x288xbf16>, vector<288x128xbf16>, vector<48x128xf32> -> vector<48x128xf32>
    %c0_3 = arith.constant 0 : index
    %c0_4 = arith.constant 0 : index
    %3 = vector.load %arg3[%c0_3, %c0_4] : memref<1x128xf32, #tpu.memory_space<vmem>>, vector<1x128xf32>
    %4 = vector.broadcast %3 : vector<1x128xf32> to vector<48x128xf32>
    %5 = arith.mulf %2, %4 : vector<48x128xf32>
    %c0_5 = arith.constant 0 : index
    %c0_6 = arith.constant 0 : index
    %6 = vector.load %arg4[%c0_5, %c0_6] : memref<1x128xf32, #tpu.memory_space<vmem>>, vector<1x128xf32>
    %7 = vector.broadcast %6 : vector<1x128xf32> to vector<48x128xf32>
    %8 = arith.addf %5, %7 : vector<48x128xf32>
    %cst_7 = arith.constant 5.000000e-01 : f32
    %9 = vector.broadcast %cst_7 : f32 to vector<48x128xf32>
    %10 = arith.mulf %9, %8 : vector<48x128xf32>
    %cst_8 = arith.constant 4.471500e-02 : f32
    %11 = vector.broadcast %cst_8 : f32 to vector<48x128xf32>
    %12 = arith.mulf %11, %8 : vector<48x128xf32>
    %13 = arith.mulf %12, %8 : vector<48x128xf32>
    %14 = arith.mulf %13, %8 : vector<48x128xf32>
    %15 = arith.addf %8, %14 : vector<48x128xf32>
    %cst_9 = arith.constant 0.797884583 : f32
    %16 = vector.broadcast %cst_9 : f32 to vector<48x128xf32>
    %17 = arith.mulf %16, %15 : vector<48x128xf32>
    %18 = math.tanh %17 : vector<48x128xf32>
    %cst_10 = arith.constant 1.000000e+00 : f32
    %19 = vector.broadcast %cst_10 : f32 to vector<48x128xf32>
    %20 = arith.addf %19, %18 : vector<48x128xf32>
    %21 = arith.mulf %10, %20 : vector<48x128xf32>
    %c0_11 = arith.constant 0 : index
    %c0_12 = arith.constant 0 : index
    %22 = vector.load %arg5[%c0_11, %c0_12] : memref<48x128xf32, #tpu.memory_space<vmem>>, vector<48x128xf32>
    %23 = arith.addf %21, %22 : vector<48x128xf32>
    %c0_13 = arith.constant 0 : index
    %c0_14 = arith.constant 0 : index
    %24 = vector.load %arg6[%c0_13, %c0_14] : memref<48x128xf32, #tpu.memory_space<vmem>>, vector<48x128xf32>
    tpu.vector_store %arg6[%c0_13, %c0_14], %23 {strides = array<i32>} : memref<48x128xf32, #tpu.memory_space<vmem>>, vector<48x128xf32>,
    return
  }
  func.func @transform_0(%arg0: i32) -> (i32, i32) {
    %c0_i32 = arith.constant 0 : i32
    %c0_i32_0 = arith.constant 0 : i32
    return %arg0, %c0_i32 : i32, i32
  }
  func.func @transform_1(%arg0: i32) -> (i32, i32) {
    %c0_i32 = arith.constant 0 : i32
    %c0_i32_0 = arith.constant 0 : i32
    %c0_i32_1 = arith.constant 0 : i32
    return %c0_i32, %c0_i32_0 : i32, i32
  }
  func.func @transform_2(%arg0: i32) -> (i32, i32) {
    %c0_i32 = arith.constant 0 : i32
    %c0_i32_0 = arith.constant 0 : i32
    %c0_i32_1 = arith.constant 0 : i32
    return %c0_i32, %c0_i32_0 : i32, i32
  }
  func.func @transform_3(%arg0: i32) -> (i32, i32) {
    %c0_i32 = arith.constant 0 : i32
    %c0_i32_0 = arith.constant 0 : i32
    %c0_i32_1 = arith.constant 0 : i32
    return %c0_i32, %c0_i32_0 : i32, i32
  }
  func.func @transform_4(%arg0: i32) -> (i32, i32) {
    %c1_i32 = arith.constant 1 : i32
    %c0_i32 = arith.constant 0 : i32
    %0 = arith.cmpi eq, %c1_i32, %c0_i32 : i32
    %c1_i32_0 = arith.constant 1 : i32
    %1 = arith.select %0, %c1_i32_0, %c1_i32 : i32
    %2 = arith.remsi %arg0, %1 : i32
    %c0_i32_1 = arith.constant 0 : i32
    %3 = arith.cmpi ne, %2, %c0_i32_1 : i32
    %c0_i32_2 = arith.constant 0 : i32
    %4 = arith.cmpi slt, %2, %c0_i32_2 : i32
    %c0_i32_3 = arith.constant 0 : i32
    %5 = arith.cmpi slt, %1, %c0_i32_3 : i32
    %6 = arith.xori %4, %5 : i1
    %7 = arith.andi %6, %3 : i1
    %8 = arith.addi %2, %1 : i32
    %9 = arith.select %7, %8, %2 : i32
    %c0_i32_4 = arith.constant 0 : i32
    %c0_i32_5 = arith.constant 0 : i32
    return %9, %c0_i32_4 : i32, i32
  }
  func.func @transform_5(%arg0: i32) -> (i32, i32) {
    %c0_i32 = arith.constant 0 : i32
    %c0_i32_0 = arith.constant 0 : i32
    return %arg0, %c0_i32 : i32, i32
  }
}

</mosaic_0001>

<bundles_post_ra>
// kernel: fvtr_embedding_forward.4
= control target key start
LH: loop header
LB: loop body
LE: loop exit
PB: predicated region body
PF: predicated region fallthrough
CT: control target
= control target key end

     0   :  { %s784_s12 = smov 0   ;;  %s836_s0 = inlined_call_operand.vmem [shape: bf16[448,9], index: 0, kind: input, shape index: {}]   ;;  %s837_s1 = inlined_call_operand.vmem [shape: bf16[9,128], index: 1, kind: input, shape index: {}]   ;;  %s838_s2 = inlined_call_operand.vmem [shape: f32[2,1,128], index: 2, kind: output, shape index: {0}]   ;;  %s839_s3 = inlined_call_operand.vmem [shape: f32[2,1,128], index: 3, kind: output, shape index: {1}]  }
   0x1 LB: > { %s790_s13 = sadd.s32 4294967295, %s761_s12   ;;  %p651_p0 = scmp.ge.s32.totalorder %s761_s12, 1  ;;  %s761_s12 = sphi %s784_s12, %s14_s12  }
   0x2   : > { %p141_p1 = scmp.lt.s32.totalorder %s761_s12, 3 }
   0x4   : > { %p142_p2 = pnand %p651_p0, %p141_p1 }
   0x5   : > { %v740_v0 = vld [vmem:[%s837_s1] sm:$0x1f] (!%p142_p2)   ;;  %vm327_vm0 = vcmask (!%p142_p2), 1043456   ;;  %vm328_vm1 = vcmask (!%p142_p2), 1044480   ;;  %s166_s16 = smul.u32 (!%p142_p2), 28, %s790_s13  ;;  %v763_v1 = vmov (!%p142_p2), 65535  }
   0x6   : > { %145 = sbr.rel (%p142_p2) target bundleno = 302 (0x12e), region = 28  ;;  %v329_v2 = vsel (!%p142_p2), %vm327_vm0, 4294967295, %v763_v1  ;;  %vm284_vm2 = vcmask (!%p142_p2), 72704   ;;  %p172_p4 = scmp.lt.s32.totalorder (!%p142_p2), %s790_s13, 1 }
   0x7   : > { %v330_v3 = vsel (!%p142_p2), %vm328_vm1, %v329_v2, 0  ;;  %p167_p3 = scmp.lt.s32.totalorder (!%p142_p2), %s166_s16, 55 }
   0x8   : > { %v332_v4 = vand.u32 (!%p142_p2), %v740_v0, %v330_v3 }
   0xa   : > { %699 = vmatprep.subr.bf16.mxu0 (!%p142_p2), %v332_v4  ;;  %729 = vmatprep.subr.bf16.mxu1 (!%p142_p2), %v332_v4 }
   0xb   : > { %700 = vmatpush3.bf16.msra.mxu0 (!%p142_p2), %v332_v4  ;;  %730 = vmatpush3.bf16.msra.mxu1 (!%p142_p2), %v332_v4 }
   0xd   : > { %s841_s16 = smov (!%p167_p3, %s166_s16), 55  ;;  %s843_s13 = smov (!%p172_p4, %s790_s13), 1 }
   0xe   : > { %s652_s17 = sshll.u32 %s841_s16, 2  ;;  %s174_s23 = scalar_lea.vmem %s838_s2, %s843_s13 }
   0xf   : > { %s170_s20 = scalar_lea.vmem %s836_s0, %s652_s17  ;;  %s177_s26 = scalar_lea.vmem %s839_s3, %s843_s13 }
  0x10   : > { %v741_v5 = vld [vmem:[%s170_s20] sm:$0xff]   ;;  %v742_v6 = vld [vmem:[%s170_s20 + $0x8] sm:$0xff]   ;;  %v743_v7 = vld [vmem:[%s170_s20 + $0x10] sm:$0xff]  }
  0x11   : > { %701 = vmatprep.mubr.msk.bf16.mxu0 %vm284_vm2, %v741_v5  ;;  %v744_v8 = vld [vmem:[%s170_s20 + $0x18] sm:$0xff]   ;;  %v745_v9 = vld [vmem:[%s170_s20 + $0x20] sm:$0xff]   ;;  %v750_v11 = vld [vmem:[%s170_s20 + $0x48] sm:$0xff]  }
  0x12   : > { %702 = vmatmul.mubr.msk.bf16.vlgmr.msra.gmra.mrb[0].mxu0 %vm284_vm2, %v742_v6  ;;  %v749_v10 = vld [vmem:[%s170_s20 + $0x40] sm:$0xff]   ;;  %v751_v12 = vld [vmem:[%s170_s20 + $0x50] sm:$0xff]   ;;  %v746_v13 = vld [vmem:[%s170_s20 + $0x28] sm:$0xff]  }
  0x13   : > { %705 = vmatprep.mubr.msk.bf16.mxu0 %vm284_vm2, %v743_v7  ;;  %717 = vmatprep.mubr.msk.bf16.mxu1 %vm284_vm2, %v749_v10  ;;  %v752_v14 = vld [vmem:[%s170_s20 + $0x58] sm:$0xff]   ;;  %v747_v15 = vld [vmem:[%s170_s20 + $0x30] sm:$0xff]   ;;  %v753_v16 = vld [vmem:[%s170_s20 + $0x60] sm:$0xff]  }
  0x14   : > { %718 = vmatmul.mubr.msk.bf16.vlgmr.msra.gmra.mrb[0].mxu1 %vm284_vm2, %v750_v11  ;;  %v748_v17 = vld [vmem:[%s170_s20 + $0x38] sm:$0xff]   ;;  %v754_v18 = vld [vmem:[%s170_s20 + $0x68] sm:$0xff]  }
  0x15   : > { %721 = vmatprep.mubr.msk.bf16.mxu1 %vm284_vm2, %v751_v12 }
  0x1a   : > { %706 = vmatmul.mubr.msk.bf16.gmra.mrb[4].mxu0 %vm284_vm2, %v744_v8 }
  0x1b   : > { %709 = vmatprep.mubr.msk.bf16.mxu0 %vm284_vm2, %v745_v9 }
  0x1c   : > { %722 = vmatmul.mubr.msk.bf16.gmra.mrb[4].mxu1 %vm284_vm2, %v752_v14 }
  0x1d   : > { %725 = vmatprep.mubr.msk.bf16.mxu1 %vm284_vm2, %v753_v16 }
  0x22   : > { %710 = vmatmul.mubr.msk.bf16.gmra.mrb[8].mxu0 %vm284_vm2, %v746_v13 }
  0x23   : > { %713 = vmatprep.mubr.msk.bf16.mxu0 %vm284_vm2, %v747_v15 }
  0x24   : > { %726 = vmatmul.mubr.msk.bf16.gmra.mrb[8].mxu1 %vm284_vm2, %v754_v18 }
  0x2a   : > { %714 = vmatmul.mubr.msk.bf16.gmra.mrb[12].mxu0 %vm284_vm2, %v748_v17 }
  0xe5   : > { %v703_v19 = vpop.f32.mrb[0].mxu0 }
  0xe6   : > { %v368_v20 = vpop.f32.mrb[1].mxu0  ;;  %v515_v26 = vmul.f32 %v703_v19, %v703_v19 }
  0xe7   : > { %v704_v21 = vpop.f32.mrb[2].mxu0  ;;  %v513_v23 = vmul.f32 %v368_v20, %v368_v20  ;;  %v815_v33 = vpop.f32.mrb[0].mxu1 }
  0xe8   : > { %v371_v22 = vpop.f32.mrb[3].mxu0  ;;  %v516_v29 = vmul.f32 %v704_v21, %v704_v21  ;;  %v432_v35 = vpop.f32.mrb[1].mxu1 }
  0xe9   : > { %v479_v24 = vadd.f32 %v371_v22, %v368_v20  ;;  %v514_v25 = vmul.f32 %v371_v22, %v371_v22  ;;  %v817_v40 = vpop.f32.mrb[2].mxu1 }
  0xea   : > { %v435_v42 = vpop.f32.mrb[3].mxu1 }
  0xeb   : > { %v480_v27 = vadd.f32 %v703_v19, %v479_v24  ;;  %v541_v28 = vadd.f32 %v514_v25, %v513_v23 }
  0xed   : > { %v542_v30 = vadd.f32 %v541_v28, %v515_v26  ;;  %v707_v31 = vpop.f32.mrb[4].mxu0  ;;  %v481_v32 = vadd.f32 %v704_v21, %v480_v27  ;;  %v529_v28 = vmul.f32 %v432_v35, %v432_v35 }
  0xee   : > { %v384_v34 = vpop.f32.mrb[5].mxu0  ;;  %v519_v46 = vmul.f32 %v707_v31, %v707_v31 }
  0xef   : > { %v482_v36 = vadd.f32 %v481_v32, %v384_v34  ;;  %v517_v37 = vmul.f32 %v384_v34, %v384_v34  ;;  %v543_v38 = vadd.f32 %v542_v30, %v516_v29  ;;  %v708_v39 = vpop.f32.mrb[6].mxu0  ;;  %v723_v53 = vpop.f32.mrb[4].mxu1  ;;  %v530_v34 = vmul.f32 %v435_v42, %v435_v42 }
  0xf0   : > { %v387_v41 = vpop.f32.mrb[7].mxu0  ;;  %v520_v49 = vmul.f32 %v708_v39, %v708_v39  ;;  %v448_v55 = vpop.f32.mrb[5].mxu1 }
  0xf1   : > { %v544_v43 = vadd.f32 %v543_v38, %v517_v37  ;;  %v483_v44 = vadd.f32 %v482_v36, %v387_v41  ;;  %v518_v45 = vmul.f32 %v387_v41, %v387_v41  ;;  %v724_v60 = vpop.f32.mrb[6].mxu1  ;;  %v531_v36 = vmul.f32 %v815_v33, %v815_v33 }
  0xf2   : > { %v451_v62 = vpop.f32.mrb[7].mxu1 }
  0xf3   : > { %v484_v47 = vadd.f32 %v707_v31, %v483_v44  ;;  %v545_v48 = vadd.f32 %v544_v43, %v518_v45  ;;  %v533_v44 = vmul.f32 %v448_v55, %v448_v55 }
  0xf5   : > { %v546_v50 = vadd.f32 %v545_v48, %v519_v46  ;;  %v711_v51 = vpop.f32.mrb[8].mxu0  ;;  %v485_v52 = vadd.f32 %v708_v39, %v484_v47  ;;  %v532_v39 = vmul.f32 %v817_v40, %v817_v40  ;;  %v534_v48 = vmul.f32 %v451_v62, %v451_v62 }
  0xf6   : > { %v400_v54 = vpop.f32.mrb[9].mxu0  ;;  %v523_v2 = vmul.f32 %v711_v51, %v711_v51 }
  0xf7   : > { %v486_v56 = vadd.f32 %v485_v52, %v400_v54  ;;  %v521_v57 = vmul.f32 %v400_v54, %v400_v54  ;;  %v547_v58 = vadd.f32 %v546_v50, %v520_v49  ;;  %v712_v59 = vpop.f32.mrb[10].mxu0  ;;  %v727_v9 = vpop.f32.mrb[8].mxu1  ;;  %v535_v49 = vmul.f32 %v723_v53, %v723_v53 }
  0xf8   : > { %v403_v61 = vpop.f32.mrb[11].mxu0  ;;  %v524_v5 = vmul.f32 %v712_v59, %v712_v59  ;;  %v464_v11 = vpop.f32.mrb[9].mxu1 }
  0xf9   : > { %v548_v63 = vadd.f32 %v547_v58, %v521_v57  ;;  %v487_v0 = vadd.f32 %v486_v56, %v403_v61  ;;  %v522_v1 = vmul.f32 %v403_v61, %v403_v61  ;;  %v728_v16 = vpop.f32.mrb[10].mxu1  ;;  %v537_v54 = vmul.f32 %v464_v11, %v464_v11 }
  0xfa   : > { %v467_v18 = vpop.f32.mrb[11].mxu1  ;;  %v539_v61 = vmul.f32 %v727_v9, %v727_v9 }
  0xfb   : > { %v488_v3 = vadd.f32 %v711_v51, %v487_v0  ;;  %v549_v4 = vadd.f32 %v548_v63, %v522_v1  ;;  %v536_v51 = vmul.f32 %v724_v60, %v724_v60  ;;  %v540_v0 = vmul.f32 %v728_v16, %v728_v16 }
  0xfd   : > { %v550_v6 = vadd.f32 %v549_v4, %v523_v2  ;;  %v715_v7 = vpop.f32.mrb[12].mxu0  ;;  %v489_v8 = vadd.f32 %v712_v59, %v488_v3 }
  0xfe   : > { %v416_v10 = vpop.f32.mrb[13].mxu0  ;;  %v527_v22 = vmul.f32 %v715_v7, %v715_v7 }
  0xff   : > { %v490_v12 = vadd.f32 %v489_v8, %v416_v10  ;;  %v525_v13 = vmul.f32 %v416_v10, %v416_v10  ;;  %v551_v14 = vadd.f32 %v550_v6, %v524_v5  ;;  %v716_v15 = vpop.f32.mrb[14].mxu0 }
 0x100   : > { %v419_v17 = vpop.f32.mrb[15].mxu0  ;;  %v528_v25 = vmul.f32 %v716_v15, %v716_v15 }
 0x101   : > { %v552_v19 = vadd.f32 %v551_v14, %v525_v13  ;;  %v491_v20 = vadd.f32 %v490_v12, %v419_v17  ;;  %v526_v21 = vmul.f32 %v419_v17, %v419_v17 }
 0x103   : > { %v492_v23 = vadd.f32 %v715_v7, %v491_v20  ;;  %v553_v24 = vadd.f32 %v552_v19, %v526_v21 }
 0x105   : > { %v554_v26 = vadd.f32 %v553_v24, %v527_v22  ;;  %v493_v27 = vadd.f32 %v716_v15, %v492_v23 }
 0x107   : > { %v494_v29 = vadd.f32 %v493_v27, %v432_v35  ;;  %v555_v30 = vadd.f32 %v554_v26, %v528_v25 }
 0x109   : > { %v556_v31 = vadd.f32 %v555_v30, %v529_v28  ;;  %v495_v32 = vadd.f32 %v494_v29, %v435_v42 }
 0x10b   : > { %v496_v37 = vadd.f32 %v815_v33, %v495_v32  ;;  %v557_v38 = vadd.f32 %v556_v31, %v530_v34 }
 0x10d   : > { %v558_v41 = vadd.f32 %v557_v38, %v531_v36  ;;  %v497_v43 = vadd.f32 %v817_v40, %v496_v37  ;;  %v538_v40 = vmul.f32 %v467_v18, %v467_v18 }
 0x10f   : > { %v498_v45 = vadd.f32 %v497_v43, %v448_v55  ;;  %v559_v46 = vadd.f32 %v558_v41, %v532_v39 }
 0x111   : > { %v560_v35 = vadd.f32 %v559_v46, %v533_v44  ;;  %v499_v47 = vadd.f32 %v498_v45, %v451_v62 }
 0x113   : > { %v500_v42 = vadd.f32 %v723_v53, %v499_v47  ;;  %v561_v50 = vadd.f32 %v560_v35, %v534_v48 }
 0x115   : > { %v562_v52 = vadd.f32 %v561_v50, %v535_v49  ;;  %v501_v33 = vadd.f32 %v724_v60, %v500_v42 }
 0x117   : > { %v502_v56 = vadd.f32 %v501_v33, %v464_v11  ;;  %v563_v57 = vadd.f32 %v562_v52, %v536_v51 }
 0x119   : > { %v564_v58 = vadd.f32 %v563_v57, %v537_v54  ;;  %v503_v59 = vadd.f32 %v502_v56, %v467_v18 }
 0x11b   : > { %v504_v55 = vadd.f32 %v727_v9, %v503_v59  ;;  %v565_v63 = vadd.f32 %v564_v58, %v538_v40 }
 0x11d   : > { %v505_v1 = vadd.f32 %v728_v16, %v504_v55  ;;  %v566_v62 = vadd.f32 %v565_v63, %v539_v61 }
 0x11f   : > { %v506_v2 = vrot.slane %v505_v1, 4  ;;  %v567_v53 = vadd.f32 %v566_v62, %v540_v0 }
 0x121   : > { %v507_v3 = vadd.f32 %v506_v2, %v505_v1  ;;  %v568_v4 = vrot.slane %v567_v53, 4 }
 0x123   : > { %v508_v5 = vrot.slane %v507_v3, 2  ;;  %v569_v60 = vadd.f32 %v568_v4, %v567_v53 }
 0x125   : > { %v509_v6 = vadd.f32 %v508_v5, %v507_v3  ;;  %v570_v7 = vrot.slane %v569_v60, 2 }
 0x127   : > { %v510_v8 = vrot.slane %v509_v6, 1  ;;  %v571_v10 = vadd.f32 %v570_v7, %v569_v60 }
 0x129   : > { %v511_v9 = vadd.f32 %v510_v8, %v509_v6  ;;  %v572_v11 = vrot.slane %v571_v10, 1 }
 0x12b   : > { %512 = vst [vmem:[%s174_s23] sm:$0x1] %v511_v9  ;;  %v573_v12 = vadd.f32 %v572_v11, %v571_v10 }
 0x12d   : > { %574 = vst [vmem:[%s177_s26] sm:$0x1] %v573_v12 }
 0x12e PF: > { %s14_s12 = sadd.s32 1, %s761_s12  }
 0x12f   : > { %p11_p5 = scmp.ge.s32.totalorder %s14_s12, 4  }
 0x131   :  { %13 = sbr.rel (!%p11_p5) target bundleno = 1 (0x1), region = 70 }

// kernel: fvtr_embedding_forward.5
= control target key start
LH: loop header
LB: loop body
LE: loop exit
PB: predicated region body
PF: predicated region fallthrough
CT: control target
= control target key end

     0   :  { %s1360_s15 = smov 0   ;;  %s1727_s0 = inlined_call_operand.vmem [shape: bf16[448,9], index: 0, kind: input, shape index: {}]   ;;  %s1728_s1 = inlined_call_operand.vmem [shape: bf16[9,128], index: 1, kind: input, shape index: {}]   ;;  %s1729_s2 = inlined_call_operand.vmem [shape: f32[1,128], index: 2, kind: input, shape index: {}]   ;;  %s1730_s3 = inlined_call_operand.vmem [shape: f32[1,128], index: 3, kind: input, shape index: {}]   ;;  %s1731_s4 = inlined_call_operand.vmem [shape: bf16[448,128], index: 4, kind: output, shape index: {}]  }
   0x1 LB: > { %s1020_s16 = sadd.s32 4294967295, %s1332_s15   ;;  %p1024_p0 = scmp.ge.s32.totalorder %s1332_s15, 1  ;;  %s1332_s15 = sphi %s1360_s15, %s14_s15  }
   0x2   : > { %p163_p1 = scmp.lt.s32.totalorder %s1332_s15, 3 }
   0x4   : > { %p164_p2 = pnand %p1024_p0, %p163_p1 }
   0x5   : > { %v1255_v0 = vld [vmem:[%s1728_s1] sm:$0x1f] (!%p164_p2)   ;;  %vm350_vm0 = vcmask (!%p164_p2), 1043456   ;;  %vm351_vm1 = vcmask (!%p164_p2), 1044480   ;;  %s189_s19 = smul.u32 (!%p164_p2), 28, %s1020_s16  ;;  %v1334_v1 = vmov (!%p164_p2), 65535  }
   0x6   : > { %167 = sbr.rel (%p164_p2) target bundleno = 326 (0x146), region = 36  ;;  %v352_v2 = vsel (!%p164_p2), %vm350_vm0, 4294967295, %v1334_v1  ;;  %vm307_vm2 = vcmask (!%p164_p2), 72704   ;;  %v1396_v19 = vld [vmem:[%s1729_s2] ss:$0 sm:$0xff] (!%p164_p2) }
   0x7   : > { %v353_v3 = vsel (!%p164_p2), %vm351_vm1, %v352_v2, 0  ;;  %p190_p3 = scmp.lt.s32.totalorder (!%p164_p2), %s189_s19, 55  ;;  %v1401_v21 = vld [vmem:[%s1730_s3] ss:$0 sm:$0xff] (!%p164_p2) }
   0x8   : > { %v355_v4 = vand.u32 (!%p164_p2), %v1255_v0, %v353_v3 }
   0xa   : > { %1214 = vmatprep.subr.bf16.mxu0 (!%p164_p2), %v355_v4  ;;  %1244 = vmatprep.subr.bf16.mxu1 (!%p164_p2), %v355_v4 }
   0xb   : > { %1215 = vmatpush3.bf16.msra.mxu0 (!%p164_p2), %v355_v4  ;;  %1245 = vmatpush3.bf16.msra.mxu1 (!%p164_p2), %v355_v4 }
   0xd   : > { %s1733_s19 = smov (!%p190_p3, %s189_s19), 55 }
   0xe   : > { %s1025_s20 = sshll.u32 %s1733_s19, 2 }
   0xf   : > { %s193_s23 = scalar_lea.vmem %s1727_s0, %s1025_s20  ;;  %s1551_s30 = scalar_lea.vmem %s1731_s4, %s1025_s20 }
  0x10   : > { %v1256_v5 = vld [vmem:[%s193_s23] sm:$0xff]   ;;  %v1258_v7 = vld [vmem:[%s193_s23 + $0x8] sm:$0xff]   ;;  %v1260_v9 = vld [vmem:[%s193_s23 + $0x10] sm:$0xff]  }
  0x11   : > { %v1257_v6 = vld [vmem:[%s193_s23 + $0x40] sm:$0xff]   ;;  %1216 = vmatprep.mubr.msk.bf16.mxu0 %vm307_vm2, %v1256_v5  ;;  %v1259_v8 = vld [vmem:[%s193_s23 + $0x48] sm:$0xff]   ;;  %v1261_v10 = vld [vmem:[%s193_s23 + $0x50] sm:$0xff]  }
  0x12   : > { %1232 = vmatprep.mubr.msk.bf16.mxu1 %vm307_vm2, %v1257_v6  ;;  %1217 = vmatmul.mubr.msk.bf16.vlgmr.msra.gmra.mrb[0].mxu0 %vm307_vm2, %v1258_v7  ;;  %v1262_v11 = vld [vmem:[%s193_s23 + $0x18] sm:$0xff]   ;;  %v1264_v13 = vld [vmem:[%s193_s23 + $0x20] sm:$0xff]   ;;  %v1266_v15 = vld [vmem:[%s193_s23 + $0x28] sm:$0xff]  }
  0x13   : > { %1233 = vmatmul.mubr.msk.bf16.vlgmr.msra.gmra.mrb[0].mxu1 %vm307_vm2, %v1259_v8  ;;  %1220 = vmatprep.mubr.msk.bf16.mxu0 %vm307_vm2, %v1260_v9  ;;  %v1263_v12 = vld [vmem:[%s193_s23 + $0x58] sm:$0xff]   ;;  %v1265_v14 = vld [vmem:[%s193_s23 + $0x60] sm:$0xff]   ;;  %v1267_v16 = vld [vmem:[%s193_s23 + $0x68] sm:$0xff]  }
  0x14   : > { %1236 = vmatprep.mubr.msk.bf16.mxu1 %vm307_vm2, %v1261_v10  ;;  %v1268_v17 = vld [vmem:[%s193_s23 + $0x30] sm:$0xff]   ;;  %v1269_v18 = vld [vmem:[%s193_s23 + $0x38] sm:$0xff]  }
  0x1a   : > { %1221 = vmatmul.mubr.msk.bf16.gmra.mrb[4].mxu0 %vm307_vm2, %v1262_v11 }
  0x1b   : > { %1237 = vmatmul.mubr.msk.bf16.gmra.mrb[4].mxu1 %vm307_vm2, %v1263_v12  ;;  %1224 = vmatprep.mubr.msk.bf16.mxu0 %vm307_vm2, %v1264_v13 }
  0x1c   : > { %1240 = vmatprep.mubr.msk.bf16.mxu1 %vm307_vm2, %v1265_v14 }
  0x22   : > { %1225 = vmatmul.mubr.msk.bf16.gmra.mrb[8].mxu0 %vm307_vm2, %v1266_v15 }
  0x23   : > { %1241 = vmatmul.mubr.msk.bf16.gmra.mrb[8].mxu1 %vm307_vm2, %v1267_v16  ;;  %1228 = vmatprep.mubr.msk.bf16.mxu0 %vm307_vm2, %v1268_v17 }
  0x2a   : > { %1229 = vmatmul.mubr.msk.bf16.gmra.mrb[12].mxu0 %vm307_vm2, %v1269_v18 }
  0xe5   : > { %v1218_v20 = vpop.f32.mrb[0].mxu0 }
  0xe6   : > { %v511_v22 = vmul.f32 %v1218_v20, %v1396_v19  ;;  %v1234_v23 = vpop.f32.mrb[0].mxu1  ;;  %v391_v24 = vpop.f32.mrb[1].mxu0 }
  0xe7   : > { %v527_v25 = vmul.f32 %v1234_v23, %v1396_v19  ;;  %v509_v26 = vmul.f32 %v1396_v19, %v391_v24  ;;  %v455_v27 = vpop.f32.mrb[1].mxu1  ;;  %v1219_v28 = vpop.f32.mrb[2].mxu0 }
  0xe8   : > { %v1407_v29 = vadd.f32 %v1401_v21, %v511_v22  ;;  %v525_v30 = vmul.f32 %v1396_v19, %v455_v27  ;;  %v512_v31 = vmul.f32 %v1219_v28, %v1396_v19  ;;  %v1235_v32 = vpop.f32.mrb[2].mxu1  ;;  %v394_v33 = vpop.f32.mrb[3].mxu0 }
  0xe9   : > { %v1412_v34 = vadd.f32 %v1401_v21, %v527_v25  ;;  %v1415_v35 = vadd.f32 %v1401_v21, %v509_v26  ;;  %v528_v36 = vmul.f32 %v1235_v32, %v1396_v19  ;;  %v458_v37 = vpop.f32.mrb[3].mxu1  ;;  %v510_v41 = vmul.f32 %v1396_v19, %v394_v33 }
  0xea   : > { %v602_v38 = vmul.f32 0.044715, %v1407_v29  ;;  %v1420_v39 = vadd.f32 %v1401_v21, %v525_v30  ;;  %v1423_v40 = vadd.f32 %v1401_v21, %v512_v31  ;;  %v526_v54 = vmul.f32 %v1396_v19, %v458_v37 }
  0xeb   : > { %v618_v42 = vmul.f32 0.044715, %v1412_v34  ;;  %v600_v43 = vmul.f32 0.044715, %v1415_v35  ;;  %v1434_v49 = vadd.f32 %v1401_v21, %v528_v36  ;;  %v1439_v53 = vadd.f32 %v1401_v21, %v510_v41 }
  0xec   : > { %v630_v44 = vmul.f32 %v602_v38, %v1407_v29  ;;  %v616_v45 = vmul.f32 0.044715, %v1420_v39  ;;  %v603_v48 = vmul.f32 0.044715, %v1423_v40  ;;  %v1461_v11 = vadd.f32 %v1401_v21, %v526_v54 }
  0xed   : > { %v646_v46 = vmul.f32 %v618_v42, %v1412_v34  ;;  %v628_v47 = vmul.f32 %v600_v43, %v1415_v35  ;;  %v1222_v50 = vpop.f32.mrb[4].mxu0  ;;  %v619_v0 = vmul.f32 0.044715, %v1434_v49  ;;  %v601_v6 = vmul.f32 0.044715, %v1439_v53 }
  0xee   : > { %v658_v51 = vmul.f32 %v630_v44, %v1407_v29  ;;  %v644_v52 = vmul.f32 %v616_v45, %v1420_v39  ;;  %v1238_v55 = vpop.f32.mrb[4].mxu1  ;;  %v407_v56 = vpop.f32.mrb[5].mxu0  ;;  %v631_v59 = vmul.f32 %v603_v48, %v1423_v40  ;;  %v617_v22 = vmul.f32 0.044715, %v1461_v11 }
  0xef   : > { %v674_v57 = vmul.f32 %v646_v46, %v1412_v34  ;;  %v656_v58 = vmul.f32 %v628_v47, %v1415_v35  ;;  %v471_v60 = vpop.f32.mrb[5].mxu1  ;;  %v1223_v61 = vpop.f32.mrb[6].mxu0  ;;  %v647_v10 = vmul.f32 %v619_v0, %v1434_v49  ;;  %v629_v15 = vmul.f32 %v601_v6, %v1439_v53 }
  0xf0   : > { %v686_v62 = vadd.f32 %v658_v51, %v1407_v29  ;;  %v672_v63 = vmul.f32 %v644_v52, %v1420_v39  ;;  %v1448_v1 = vpop.f32.mrb[6].mxu1  ;;  %v1450_v2 = vpop.f32.mrb[7].mxu0  ;;  %v659_v5 = vmul.f32 %v631_v59, %v1423_v40  ;;  %v515_v25 = vmul.f32 %v1222_v50, %v1396_v19 }
  0xf1   : > { %v702_v3 = vadd.f32 %v674_v57, %v1412_v34  ;;  %v684_v4 = vadd.f32 %v656_v58, %v1415_v35  ;;  %v1456_v7 = vpop.f32.mrb[7].mxu1  ;;  %v675_v17 = vmul.f32 %v647_v10, %v1434_v49  ;;  %v657_v20 = vmul.f32 %v629_v15, %v1439_v53 }
  0xf2   : > { %v714_v8 = vmul.f32 0.7978846, %v686_v62  ;;  %v700_v9 = vadd.f32 %v672_v63, %v1420_v39  ;;  %v687_v14 = vadd.f32 %v659_v5, %v1423_v40  ;;  %v531_v26 = vmul.f32 %v1238_v55, %v1396_v19 }
  0xf3   : > { %v730_v12 = vmul.f32 0.7978846, %v702_v3  ;;  %v712_v13 = vmul.f32 0.7978846, %v684_v4  ;;  %v703_v24 = vadd.f32 %v675_v17, %v1434_v49  ;;  %v685_v30 = vadd.f32 %v657_v20, %v1439_v53 }
  0xf4   : > { %1270 = vtanh.f32 %v714_v8  ;;  %v728_v16 = vmul.f32 0.7978846, %v700_v9  ;;  %v715_v18 = vmul.f32 0.7978846, %v687_v14  ;;  %v645_v31 = vmul.f32 %v617_v22, %v1461_v11 }
  0xf5   : > { %1272 = vtanh.f32 %v730_v12  ;;  %v1468_v23 = vpop.f32.mrb[8].mxu0  ;;  %v513_v32 = vmul.f32 %v1396_v19, %v407_v56  ;;  %v731_v37 = vmul.f32 0.7978846, %v703_v24  ;;  %v1485_v38 = vadd.f32 %v1401_v21, %v515_v25 }
  0xf6   : > { %1274 = vtanh.f32 %v712_v13  ;;  %v1473_v27 = vpop.f32.mrb[8].mxu1  ;;  %v1475_v28 = vpop.f32.mrb[9].mxu0  ;;  %v1488_v41 = vadd.f32 %v1401_v21, %v531_v26  ;;  %v713_v44 = vmul.f32 0.7978846, %v685_v30  ;;  %v673_v45 = vmul.f32 %v645_v31, %v1461_v11 }
  0xf7   : > { %1276 = vtanh.f32 %v728_v16  ;;  %v1480_v33 = vpop.f32.mrb[9].mxu1  ;;  %v1482_v36 = vpop.f32.mrb[10].mxu0  ;;  %v1496_v46 = vadd.f32 %v1401_v21, %v513_v32  ;;  %v529_v47 = vmul.f32 %v1396_v19, %v471_v60  ;;  %v574_v50 = vmul.f32 0.5, %v1407_v29 }
  0xf8   : > { %1278 = vtanh.f32 %v715_v18  ;;  %v1490_v42 = vpop.f32.mrb[10].mxu1  ;;  %v1492_v43 = vpop.f32.mrb[11].mxu0  ;;  %v590_v51 = vmul.f32 0.5, %v1412_v34  ;;  %v606_v52 = vmul.f32 0.044715, %v1485_v38  ;;  %v572_v54 = vmul.f32 0.5, %v1415_v35 }
  0xf9   : > { %v1499_v48 = vpop.f32.mrb[11].mxu1  ;;  %1280 = vtanh.f32 %v731_v37  ;;  %v701_v55 = vadd.f32 %v673_v45, %v1461_v11  ;;  %v622_v56 = vmul.f32 0.044715, %v1488_v41  ;;  %v604_v58 = vmul.f32 0.044715, %v1496_v46 }
  0xfa   : > { %1282 = vtanh.f32 %v713_v44  ;;  %v634_v57 = vmul.f32 %v606_v52, %v1485_v38  ;;  %v1510_v59 = vadd.f32 %v1401_v21, %v529_v47  ;;  %v516_v29 = vmul.f32 %v1223_v61, %v1396_v19 }
  0xfb   : > { %v588_v34 = vmul.f32 0.5, %v1420_v39  ;;  %v575_v60 = vmul.f32 0.5, %v1423_v40  ;;  %v729_v62 = vmul.f32 0.7978846, %v701_v55  ;;  %v650_v35 = vmul.f32 %v622_v56, %v1488_v41 }
  0xfc   : > { %v591_v3 = vmul.f32 0.5, %v1434_v49  ;;  %v662_v4 = vmul.f32 %v634_v57, %v1485_v38  ;;  %v632_v5 = vmul.f32 %v604_v58, %v1496_v46  ;;  %v620_v6 = vmul.f32 0.044715, %v1510_v59 }
  0xfd   : > { %v1516_v63 = vpop.f32.mrb[12].mxu0  ;;  %1284 = vtanh.f32 %v729_v62  ;;  %v678_v40 = vmul.f32 %v650_v35, %v1488_v41  ;;  %v1526_v9 = vadd.f32 %v1401_v21, %v516_v29  ;;  %v573_v20 = vmul.f32 0.5, %v1439_v53 }
  0xfe   : > { %v1271_v0 = vpop.eup %1270  ;;  %v1522_v8 = vpop.f32.mrb[13].mxu0  ;;  %v690_v13 = vadd.f32 %v662_v4, %v1485_v38  ;;  %v660_v14 = vmul.f32 %v632_v5, %v1496_v46  ;;  %v648_v15 = vmul.f32 %v620_v6, %v1510_v59  ;;  %v589_v22 = vmul.f32 0.5, %v1461_v11 }
  0xff   : > { %v1273_v61 = vpop.eup %1272  ;;  %v770_v39 = vadd.f32 1.0, %v1271_v0  ;;  %v1528_v10 = vpop.f32.mrb[14].mxu0  ;;  %v706_v24 = vadd.f32 %v678_v40, %v1488_v41  ;;  %v532_v31 = vmul.f32 %v1448_v1, %v1396_v19  ;;  %v514_v32 = vmul.f32 %v1396_v19, %v1450_v2 }
 0x100   : > { %v1275_v12 = vpop.eup %1274  ;;  %v786_v49 = vadd.f32 1.0, %v1273_v61  ;;  %v1533_v16 = vpop.f32.mrb[15].mxu0  ;;  %v718_v26 = vmul.f32 0.7978846, %v690_v13  ;;  %v688_v30 = vadd.f32 %v660_v14, %v1496_v46  ;;  %v676_v53 = vmul.f32 %v648_v15, %v1510_v59 }
 0x101   : > { %v1277_v17 = vpop.eup %1276  ;;  %v768_v18 = vadd.f32 1.0, %v1275_v12  ;;  %v798_v37 = vmul.f32 %v770_v39, %v574_v50  ;;  %v734_v45 = vmul.f32 0.7978846, %v706_v24  ;;  %v607_v56 = vmul.f32 0.044715, %v1526_v9 }
 0x102   : > { %v1279_v25 = vpop.eup %1278  ;;  %v814_v11 = vmul.f32 %v786_v49, %v590_v51  ;;  %v784_v55 = vadd.f32 1.0, %v1277_v17  ;;  %v716_v62 = vmul.f32 0.7978846, %v688_v30  ;;  %v704_v1 = vadd.f32 %v676_v53, %v1510_v59 }
 0x103   : > { %v771_v44 = vadd.f32 1.0, %v1279_v25  ;;  %v1281_v47 = vpop.eup %1280  ;;  %v796_v52 = vmul.f32 %v768_v18, %v572_v54  ;;  %1286 = vtanh.f32 %v718_v26  ;;  %v635_v50 = vmul.f32 %v607_v56, %v1526_v9 }
 0x104   : > { %v1283_v57 = vpop.eup %1282  ;;  %v787_v29 = vadd.f32 1.0, %v1281_v47  ;;  %v1555_v51 = vadd.f32 %v1401_v21, %v532_v31  ;;  %1288 = vtanh.f32 %v734_v45  ;;  %v1558_v35 = vadd.f32 %v1401_v21, %v514_v32 }
 0x105   : > { %v799_v58 = vmul.f32 %v771_v44, %v575_v60  ;;  %v769_v2 = vadd.f32 1.0, %v1283_v57  ;;  %v812_v0 = vmul.f32 %v784_v55, %v588_v34  ;;  %v663_v5 = vmul.f32 %v635_v50, %v1526_v9 }
 0x106   : > { %v815_v60 = vmul.f32 %v787_v29, %v591_v3  ;;  %v623_v6 = vmul.f32 0.044715, %v1555_v51  ;;  %1290 = vtanh.f32 %v716_v62  ;;  %v732_v40 = vmul.f32 0.7978846, %v704_v1 }
 0x107   : > { %v1124_v54 = vpack.c.bf16 %v799_v58, %v798_v37  ;;  %v797_v4 = vmul.f32 %v769_v2, %v573_v20  ;;  %v1285_v61 = vpop.eup %1284  ;;  %v605_v12 = vmul.f32 0.044715, %v1558_v35  ;;  %v691_v13 = vadd.f32 %v663_v5, %v1526_v9 }
 0x108   : > { %v1164_v39 = vpack.c.bf16 %v815_v60, %v814_v11  ;;  %v785_v49 = vadd.f32 1.0, %v1285_v61  ;;  %v651_v14 = vmul.f32 %v623_v6, %v1555_v51  ;;  %v530_v15 = vmul.f32 %v1396_v19, %v1456_v7 }
 0x109   : > { %1186 = vst [vmem:[%s1551_s30 + $0x8] sm:$0xff] %v1124_v54   ;;  %v1119_v3 = vpack.c.bf16 %v797_v4, %v796_v52  ;;  %v633_v34 = vmul.f32 %v605_v12, %v1558_v35  ;;  %v519_v17 = vmul.f32 %v1468_v23, %v1396_v19  ;;  %v535_v18 = vmul.f32 %v1473_v27, %v1396_v19 }
 0x10a   : > { %1194 = vst [vmem:[%s1551_s30 + $0x48] sm:$0xff] %v1164_v39   ;;  %v813_v20 = vmul.f32 %v785_v49, %v589_v22  ;;  %v719_v24 = vmul.f32 0.7978846, %v691_v13  ;;  %v679_v25 = vmul.f32 %v651_v14, %v1555_v51  ;;  %v517_v26 = vmul.f32 %v1396_v19, %v1475_v28 }
 0x10b   : > { %1120 = vst [vmem:[%s1551_s30] sm:$0xff] %v1119_v3   ;;  %v661_v30 = vmul.f32 %v633_v34, %v1558_v35  ;;  %v1580_v31 = vadd.f32 %v1401_v21, %v530_v15  ;;  %v1583_v7 = vadd.f32 %v1401_v21, %v519_v17  ;;  %v1589_v37 = vadd.f32 %v1401_v21, %v535_v18 }
 0x10c   : > { %v1159_v23 = vpack.c.bf16 %v813_v20, %v812_v0  ;;  %1292 = vtanh.f32 %v719_v24  ;;  %v707_v27 = vadd.f32 %v679_v25, %v1555_v51  ;;  %v1594_v53 = vadd.f32 %v1401_v21, %v517_v26 }
 0x10d   : > { %v689_v22 = vadd.f32 %v661_v30, %v1558_v35  ;;  %v621_v32 = vmul.f32 0.044715, %v1580_v31  ;;  %v1287_v28 = vpop.eup %1286  ;;  %1294 = vtanh.f32 %v732_v40  ;;  %v610_v45 = vmul.f32 0.044715, %v1583_v7 }
 0x10e   : > { %1193 = vst [vmem:[%s1551_s30 + $0x40] sm:$0xff] %v1159_v23   ;;  %v735_v44 = vmul.f32 0.7978846, %v707_v27  ;;  %v1289_v47 = vpop.eup %1288  ;;  %v578_v11 = vmul.f32 0.5, %v1485_v38  ;;  %v594_v52 = vmul.f32 0.5, %v1488_v41  ;;  %v576_v57 = vmul.f32 0.5, %v1496_v46 }
 0x10f   : > { %v717_v55 = vmul.f32 0.7978846, %v689_v22  ;;  %v649_v56 = vmul.f32 %v621_v32, %v1580_v31  ;;  %v1601_v58 = vmul.f32 0.5, %v1510_v59  ;;  %v638_v29 = vmul.f32 %v610_v45, %v1583_v7 }
 0x110   : > { %1296 = vtanh.f32 %v735_v44  ;;  %v1291_v62 = vpop.eup %1290  ;;  %v579_v1 = vmul.f32 0.5, %v1526_v9  ;;  %v626_v38 = vmul.f32 0.044715, %v1589_v37  ;;  %v774_v41 = vadd.f32 1.0, %v1287_v28 }
 0x111   : > { %1298 = vtanh.f32 %v717_v55  ;;  %v677_v2 = vmul.f32 %v649_v56, %v1580_v31  ;;  %v790_v50 = vadd.f32 1.0, %v1289_v47  ;;  %v666_v54 = vmul.f32 %v638_v29, %v1583_v7 }
 0x112   : > { %v608_v46 = vmul.f32 0.044715, %v1594_v53  ;;  %v654_v60 = vmul.f32 %v626_v38, %v1589_v37  ;;  %v533_v0 = vmul.f32 %v1396_v19, %v1480_v33  ;;  %v520_v9 = vmul.f32 %v1482_v36, %v1396_v19 }
 0x113   : > { %v705_v59 = vadd.f32 %v677_v2, %v1580_v31  ;;  %v772_v4 = vadd.f32 1.0, %v1291_v62  ;;  %v694_v5 = vadd.f32 %v666_v54, %v1583_v7  ;;  %v536_v61 = vmul.f32 %v1490_v42, %v1396_v19 }
 0x114   : > { %v636_v6 = vmul.f32 %v608_v46, %v1594_v53  ;;  %v682_v40 = vmul.f32 %v654_v60, %v1589_v37  ;;  %v1621_v12 = vadd.f32 %v1401_v21, %v533_v0  ;;  %v1624_v3 = vadd.f32 %v1401_v21, %v520_v9 }
 0x115   : > { %v733_v39 = vmul.f32 0.7978846, %v705_v59  ;;  %v595_v36 = vmul.f32 0.5, %v1555_v51  ;;  %v1629_v13 = vadd.f32 %v1401_v21, %v536_v61  ;;  %v518_v42 = vmul.f32 %v1396_v19, %v1492_v43 }
 0x116   : > { %v1293_v33 = vpop.eup %1292  ;;  %v664_v49 = vmul.f32 %v636_v6, %v1594_v53  ;;  %v577_v34 = vmul.f32 0.5, %v1558_v35  ;;  %v710_v15 = vadd.f32 %v682_v40, %v1589_v37  ;;  %v802_v18 = vmul.f32 %v774_v41, %v578_v11 }
 0x117   : > { %v775_v14 = vadd.f32 1.0, %v1293_v33  ;;  %1300 = vtanh.f32 %v733_v39  ;;  %v1295_v17 = vpop.eup %1294  ;;  %v818_v20 = vmul.f32 %v790_v50, %v594_v52  ;;  %v722_v24 = vmul.f32 0.7978846, %v694_v5 }
 0x118   : > { %v624_v51 = vmul.f32 0.044715, %v1621_v12  ;;  %v800_v25 = vmul.f32 %v772_v4, %v576_v57  ;;  %v692_v30 = vadd.f32 %v664_v49, %v1594_v53  ;;  %v611_v23 = vmul.f32 0.044715, %v1624_v3 }
 0x119   : > { %v803_v26 = vmul.f32 %v775_v14, %v579_v1  ;;  %v738_v27 = vmul.f32 0.7978846, %v710_v15  ;;  %v627_v22 = vmul.f32 0.044715, %v1629_v13  ;;  %v1641_v32 = vadd.f32 %v1401_v21, %v518_v42 }
 0x11a   : > { %v1297_v43 = vpop.eup %1296  ;;  %v652_v35 = vmul.f32 %v624_v51, %v1621_v12  ;;  %v788_v44 = vadd.f32 1.0, %v1295_v17  ;;  %v639_v11 = vmul.f32 %v611_v23, %v1624_v3  ;;  %1302 = vtanh.f32 %v722_v24 }
 0x11b   : > { %v1299_v28 = vpop.eup %1298  ;;  %v1134_v45 = vpack.c.bf16 %v803_v26, %v802_v18  ;;  %v791_v47 = vadd.f32 1.0, %v1297_v43  ;;  %v655_v56 = vmul.f32 %v627_v22, %v1629_v13  ;;  %v720_v29 = vmul.f32 0.7978846, %v692_v30 }
 0x11c   : > { %v773_v52 = vadd.f32 1.0, %v1299_v28  ;;  %v680_v55 = vmul.f32 %v652_v35, %v1621_v12  ;;  %v667_v62 = vmul.f32 %v639_v11, %v1624_v3  ;;  %v609_v1 = vmul.f32 0.044715, %v1641_v32 }
 0x11d   : > { %1188 = vst [vmem:[%s1551_s30 + $0x18] sm:$0xff] %v1134_v45   ;;  %v819_v57 = vmul.f32 %v791_v47, %v595_v36  ;;  %1304 = vtanh.f32 %v738_v27  ;;  %v683_v38 = vmul.f32 %v655_v56, %v1629_v13  ;;  %v534_v41 = vmul.f32 %v1396_v19, %v1499_v48 }
 0x11e   : > { %v801_v2 = vmul.f32 %v773_v52, %v577_v34  ;;  %v695_v54 = vadd.f32 %v667_v62, %v1624_v3  ;;  %v637_v46 = vmul.f32 %v609_v1, %v1641_v32  ;;  %v523_v59 = vmul.f32 %v1516_v63, %v1396_v19 }
 0x11f   : > { %v1174_v50 = vpack.c.bf16 %v819_v57, %v818_v20  ;;  %v708_v0 = vadd.f32 %v680_v55, %v1621_v12  ;;  %v711_v9 = vadd.f32 %v683_v38, %v1629_v13  ;;  %v1659_v4 = vadd.f32 %v1401_v21, %v534_v41 }
 0x120   : > { %v1129_v60 = vpack.c.bf16 %v801_v2, %v800_v25  ;;  %v723_v6 = vmul.f32 0.7978846, %v695_v54  ;;  %v665_v48 = vmul.f32 %v637_v46, %v1641_v32  ;;  %v1664_v61 = vadd.f32 %v1401_v21, %v523_v59 }
 0x121   : > { %v1301_v5 = vpop.eup %1300  ;;  %1196 = vst [vmem:[%s1551_s30 + $0x58] sm:$0xff] %v1174_v50   ;;  %v521_v39 = vmul.f32 %v1396_v19, %v1522_v8  ;;  %v593_v63 = vmul.f32 0.5, %v1580_v31  ;;  %1306 = vtanh.f32 %v720_v29  ;;  %v739_v33 = vmul.f32 0.7978846, %v711_v9 }
 0x122   : > { %1187 = vst [vmem:[%s1551_s30 + $0x10] sm:$0xff] %v1129_v60   ;;  %v789_v40 = vadd.f32 1.0, %v1301_v5  ;;  %1308 = vtanh.f32 %v723_v6  ;;  %v693_v36 = vadd.f32 %v665_v48, %v1641_v32  ;;  %v625_v49 = vmul.f32 0.044715, %v1659_v4 }
 0x123   : > { %v816_v42 = vmul.f32 %v788_v44, %v1601_v58  ;;  %1310 = vtanh.f32 %v739_v33  ;;  %v614_v34 = vmul.f32 0.044715, %v1664_v61  ;;  %v736_v15 = vmul.f32 0.7978846, %v708_v0 }
 0x124   : > { %v817_v14 = vmul.f32 %v789_v40, %v593_v63  ;;  %v721_v8 = vmul.f32 0.7978846, %v693_v36  ;;  %v653_v17 = vmul.f32 %v625_v49, %v1659_v4  ;;  %v1676_v31 = vadd.f32 %v1401_v21, %v521_v39  ;;  %v1303_v18 = vpop.eup %1302 }
 0x125   : > { %v642_v24 = vmul.f32 %v614_v34, %v1664_v61  ;;  %v524_v51 = vmul.f32 %v1528_v10, %v1396_v19  ;;  %v522_v27 = vmul.f32 %v1396_v19, %v1533_v16  ;;  %v582_v28 = vmul.f32 0.5, %v1583_v7 }
 0x126   : > { %v1169_v20 = vpack.c.bf16 %v817_v14, %v816_v42  ;;  %1312 = vtanh.f32 %v721_v8  ;;  %v681_v58 = vmul.f32 %v653_v17, %v1659_v4  ;;  %v612_v30 = vmul.f32 0.044715, %v1676_v31 }
 0x127   : > { %v1305_v25 = vpop.eup %1304  ;;  %v670_v26 = vmul.f32 %v642_v24, %v1664_v61  ;;  %v1686_v23 = vadd.f32 %v1401_v21, %v524_v51  ;;  %1314 = vtanh.f32 %v736_v15  ;;  %v778_v44 = vadd.f32 1.0, %v1303_v18 }
 0x128   : > { %1195 = vst [vmem:[%s1551_s30 + $0x50] sm:$0xff] %v1169_v20   ;;  %v709_v43 = vadd.f32 %v681_v58, %v1659_v4  ;;  %v640_v35 = vmul.f32 %v612_v30, %v1676_v31  ;;  %v1696_v47 = vadd.f32 %v1401_v21, %v522_v27  ;;  %v598_v52 = vmul.f32 0.5, %v1589_v37 }
 0x129   : > { %v698_v10 = vadd.f32 %v670_v26, %v1664_v61  ;;  %v615_v22 = vmul.f32 0.044715, %v1686_v23  ;;  %v794_v57 = vadd.f32 1.0, %v1305_v25  ;;  %v583_v29 = vmul.f32 0.5, %v1624_v3 }
 0x12a   : > { %v737_v45 = vmul.f32 0.7978846, %v709_v43  ;;  %v668_v56 = vmul.f32 %v640_v35, %v1676_v31  ;;  %v613_v7 = vmul.f32 0.044715, %v1696_v47  ;;  %v599_v21 = vmul.f32 0.5, %v1629_v13 }
 0x12b   : > { %v1307_v11 = vpop.eup %1306  ;;  %v726_v55 = vmul.f32 0.7978846, %v698_v10  ;;  %v643_v19 = vmul.f32 %v615_v22, %v1686_v23  ;;  %v806_v38 = vmul.f32 %v778_v44, %v582_v28  ;;  %v822_v0 = vmul.f32 %v794_v57, %v598_v52 }
 0x12c   : > { %v1309_v16 = vpop.eup %1308  ;;  %1316 = vtanh.f32 %v737_v45  ;;  %v696_v2 = vadd.f32 %v668_v56, %v1676_v31  ;;  %v776_v41 = vadd.f32 1.0, %v1307_v11  ;;  %v641_v54 = vmul.f32 %v613_v7, %v1696_v47 }
 0x12d   : > { %v1311_v62 = vpop.eup %1310  ;;  %v779_v1 = vadd.f32 1.0, %v1309_v16  ;;  %v671_v37 = vmul.f32 %v643_v19, %v1686_v23  ;;  %1318 = vtanh.f32 %v726_v55  ;;  %v580_v13 = vmul.f32 0.5, %v1594_v53 }
 0x12e   : > { %v795_v50 = vadd.f32 1.0, %v1311_v62  ;;  %v724_v59 = vmul.f32 0.7978846, %v696_v2  ;;  %v669_v5 = vmul.f32 %v641_v54, %v1696_v47  ;;  %v581_v48 = vmul.f32 0.5, %v1641_v32 }
 0x12f   : > { %v807_v46 = vmul.f32 %v779_v1, %v583_v29  ;;  %v699_v3 = vadd.f32 %v671_v37, %v1686_v23  ;;  %v804_v49 = vmul.f32 %v776_v41, %v580_v13  ;;  %v596_v32 = vmul.f32 0.5, %v1621_v12 }
 0x130   : > { %v1313_v60 = vpop.eup %1312  ;;  %v823_v9 = vmul.f32 %v795_v50, %v599_v21  ;;  %1320 = vtanh.f32 %v724_v59  ;;  %v697_v36 = vadd.f32 %v669_v5, %v1696_v47  ;;  %v597_v8 = vmul.f32 0.5, %v1659_v4 }
 0x131   : > { %v1144_v6 = vpack.c.bf16 %v807_v46, %v806_v38  ;;  %v777_v39 = vadd.f32 1.0, %v1313_v60  ;;  %v727_v63 = vmul.f32 0.7978846, %v699_v3  ;;  %v1315_v40 = vpop.eup %1314  ;;  %v586_v30 = vmul.f32 0.5, %v1664_v61 }
 0x132   : > { %v1184_v33 = vpack.c.bf16 %v823_v9, %v822_v0  ;;  %v725_v53 = vmul.f32 0.7978846, %v697_v36  ;;  %v792_v14 = vadd.f32 1.0, %v1315_v40  ;;  %v587_v43 = vmul.f32 0.5, %v1686_v23 }
 0x133   : > { %1190 = vst [vmem:[%s1551_s30 + $0x28] sm:$0xff] %v1144_v6   ;;  %v805_v42 = vmul.f32 %v777_v39, %v581_v48  ;;  %1322 = vtanh.f32 %v727_v63  ;;  %v584_v22 = vmul.f32 0.5, %v1676_v31  ;;  %v585_v28 = vmul.f32 0.5, %v1696_v47 }
 0x134   : > { %1198 = vst [vmem:[%s1551_s30 + $0x68] sm:$0xff] %v1184_v33   ;;  %1324 = vtanh.f32 %v725_v53  ;;  %v820_v20 = vmul.f32 %v792_v14, %v596_v32 }
 0x135   : > { %v1139_v34 = vpack.c.bf16 %v805_v42, %v804_v49 }
 0x136   : > { %v1317_v15 = vpop.eup %1316 }
 0x137   : > { %1189 = vst [vmem:[%s1551_s30 + $0x20] sm:$0xff] %v1139_v34   ;;  %v793_v17 = vadd.f32 1.0, %v1317_v15  ;;  %v1319_v18 = vpop.eup %1318 }
 0x138   : > { %v782_v25 = vadd.f32 1.0, %v1319_v18 }
 0x139   : > { %v821_v24 = vmul.f32 %v793_v17, %v597_v8 }
 0x13a   : > { %v1321_v58 = vpop.eup %1320  ;;  %v810_v35 = vmul.f32 %v782_v25, %v586_v30 }
 0x13b   : > { %v1179_v51 = vpack.c.bf16 %v821_v24, %v820_v20  ;;  %v780_v12 = vadd.f32 1.0, %v1321_v58 }
 0x13d   : > { %v1323_v26 = vpop.eup %1322  ;;  %1197 = vst [vmem:[%s1551_s30 + $0x60] sm:$0xff] %v1179_v51   ;;  %v808_v11 = vmul.f32 %v780_v12, %v584_v22 }
 0x13e   : > { %v783_v27 = vadd.f32 1.0, %v1323_v26  ;;  %v1325_v10 = vpop.eup %1324 }
 0x13f   : > { %v781_v44 = vadd.f32 1.0, %v1325_v10 }
 0x140   : > { %v811_v4 = vmul.f32 %v783_v27, %v587_v43 }
 0x141   : > { %v809_v52 = vmul.f32 %v781_v44, %v585_v28 }
 0x142   : > { %v1154_v45 = vpack.c.bf16 %v811_v4, %v810_v35 }
 0x143   : > { %v1149_v55 = vpack.c.bf16 %v809_v52, %v808_v11 }
 0x144   : > { %1192 = vst [vmem:[%s1551_s30 + $0x38] sm:$0xff] %v1154_v45  }
 0x145   : > { %1191 = vst [vmem:[%s1551_s30 + $0x30] sm:$0xff] %v1149_v55  }
 0x146 PF: > { %s14_s15 = sadd.s32 1, %s1332_s15  }
 0x147   : > { %p11_p4 = scmp.ge.s32.totalorder %s14_s15, 4  }
 0x149   :  { %13 = sbr.rel (!%p11_p4) target bundleno = 1 (0x1), region = 66 }

// kernel: fvtr_embedding_forward.6
= control target key start
LH: loop header
LB: loop body
LE: loop exit
PB: predicated region body
PF: predicated region fallthrough
CT: control target
= control target key end

     0   :  { %s773_s12 = smov 0   ;;  %s869_s0 = inlined_call_operand.vmem [shape: bf16[96,288], index: 0, kind: input, shape index: {}]   ;;  %s870_s1 = inlined_call_operand.vmem [shape: bf16[288,128], index: 1, kind: input, shape index: {}]   ;;  %s871_s2 = inlined_call_operand.vmem [shape: f32[2,1,128], index: 2, kind: output, shape index: {0}]   ;;  %s872_s3 = inlined_call_operand.vmem [shape: f32[2,1,128], index: 3, kind: output, shape index: {1}]  }
   0x1 LB: > { %s779_s13 = sadd.s32 4294967295, %s749_s12   ;;  %p613_p0 = scmp.ge.s32.totalorder %s749_s12, 1  ;;  %s749_s12 = sphi %s773_s12, %s14_s12  }
   0x2   : > { %p142_p1 = scmp.lt.s32.totalorder %s749_s12, 3 }
   0x4   : > { %p143_p2 = pnand %p613_p0, %p142_p1 }
   0x5   : > { %v713_v0 = vld [vmem:[%s870_s1 + $0x40] sm:$0xff] (!%p143_p2)   ;;  %v751_v2 = vmov (!%p143_p2), 0.0   ;;  %s168_s18 = smul.u32 (!%p143_p2), 6, %s779_s13  ;;  %v715_v3 = vld [vmem:[%s870_s1 + $0x48] sm:$0xff] (!%p143_p2)   ;;  %vm752_vm0 = vmmov (!%p143_p2), 0   ;;  %v717_v5 = vld [vmem:[%s870_s1 + $0x50] sm:$0xff] (!%p143_p2)  }
   0x6   : > { %146 = sbr.rel (%p143_p2) target bundleno = 290 (0x122), region = 28  ;;  %v714_v1 = vld [vmem:[%s870_s1] sm:$0xff] (!%p143_p2)   ;;  %686 = vmatprep.subr.bf16.mxu1 (!%p143_p2), %v751_v2  ;;  %647 = vmatprep.subr.bf16.mxu0 (!%p143_p2), %v713_v0  ;;  %v716_v4 = vld [vmem:[%s870_s1 + $0x8] sm:$0xff] (!%p143_p2)   ;;  %v718_v6 = vld [vmem:[%s870_s1 + $0x10] sm:$0xff] (!%p143_p2)   ;;  %vm383_vm1 = vcmask (!%p143_p2), 261120   ;;  %p175_p4 = scmp.lt.s32.totalorder (!%p143_p2), %s779_s13, 1 }
   0x7   : > { %648 = vmatpush3.bf16.msra.mxu0 (!%p143_p2), %v714_v1  ;;  %690 = vmatprep.mubr.msk.bf16.mxu1 (!%p143_p2), %vm752_vm0, %v751_v2  ;;  %p169_p3 = scmp.lt.s32.totalorder (!%p143_p2), %s168_s18, 11  ;;  %v719_v7 = vld [vmem:[%s870_s1 + $0x58] sm:$0xff] (!%p143_p2)   ;;  %v721_v9 = vld [vmem:[%s870_s1 + $0x60] sm:$0xff] (!%p143_p2)   ;;  %v723_v12 = vld [vmem:[%s870_s1 + $0x68] sm:$0xff] (!%p143_p2)  }
   0x8   : > { %649 = vmatprep.subr.bf16.mxu0 (!%p143_p2), %v715_v3  ;;  %v720_v8 = vld [vmem:[%s870_s1 + $0x18] sm:$0xff] (!%p143_p2)   ;;  %v727_v10 = vld [vmem:[%s870_s1 + $0x80] sm:$0xff] (!%p143_p2)   ;;  %v724_v13 = vld [vmem:[%s870_s1 + $0x28] sm:$0xff] (!%p143_p2)  }
   0x9   : > { %v722_v11 = vld [vmem:[%s870_s1 + $0x20] sm:$0xff] (!%p143_p2)   ;;  %687 = vmatpush3.bf16.msra.mxu1 (!%p143_p2), %v727_v10  ;;  %v730_v14 = vld [vmem:[%s870_s1 + $0x88] sm:$0xff] (!%p143_p2)   ;;  %v725_v15 = vld [vmem:[%s870_s1 + $0x70] sm:$0xff] (!%p143_p2)  }
   0xa   : > { %688 = vmatprep.subr.bf16.mxu1 (!%p143_p2), %v751_v2  ;;  %v726_v18 = vld [vmem:[%s870_s1 + $0x30] sm:$0xff] (!%p143_p2)   ;;  %v728_v19 = vld [vmem:[%s870_s1 + $0x78] sm:$0xff] (!%p143_p2)  }
   0xb   : > { %650 = vmatpush3.bf16.msra.mxu0 (!%p143_p2), %v716_v4  ;;  %v729_v20 = vld [vmem:[%s870_s1 + $0x38] sm:$0xff] (!%p143_p2)  }
   0xc   : > { %651 = vmatprep.subr.bf16.mxu0 (!%p143_p2), %v717_v5 }
   0xd   : > { %s874_s18 = smov (!%p169_p3, %s168_s18), 11  ;;  %689 = vmatpush3.bf16.msra.mxu1 %v730_v14  ;;  %s876_s13 = smov (!%p175_p4, %s779_s13), 1 }
   0xe   : > { %s702_s6 = smul.u32 12, %s874_s18  ;;  %s177_s5 = scalar_lea.vmem %s871_s2, %s876_s13 }
   0xf   : > { %652 = vmatpush3.bf16.msra.mxu0 %v718_v6  ;;  %s180_s8 = scalar_lea.vmem %s872_s3, %s876_s13 }
  0x10   : > { %653 = vmatprep.subr.bf16.mxu0 %v719_v7  ;;  %s824_s17 = scalar_lea.vmem %s869_s0, %s702_s6 }
  0x11   : > { %v733_v16 = vld [vmem:[%s824_s17 + $0x4] ss:$12 sps:$4 sm:$0xff]   ;;  %v734_v17 = vld [vmem:[%s824_s17 + $0x8] ss:$12 sps:$4 sm:$0xff]   ;;  %v738_v21 = vld [vmem:[%s824_s17 + $0x20] ss:$12 sps:$4 sm:$0xff]  }
  0x12   : > { %425 = vmatprep.mubr.bf16.mxu0 %v733_v16  ;;  %691 = vmatmul.mubr.msk.bf16.vlgmr.msra.gmra.mrb[0].mxu1 %vm383_vm1, %v734_v17  ;;  %v731_v22 = vld [vmem:[%s824_s17] ss:$12 sps:$4 sm:$0xff]   ;;  %v735_v23 = vld [vmem:[%s824_s17 + $0x1c] ss:$12 sps:$4 sm:$0xff]   ;;  %v742_v24 = vld [vmem:[%s824_s17 + $0x38] ss:$12 sps:$4 sm:$0xff]  }
  0x13   : > { %654 = vmatpush3.bf16.msra.mxu0 %v720_v8  ;;  %694 = vmatprep.mubr.msk.bf16.mxu1 %vm752_vm0, %v751_v2  ;;  %v737_v25 = vld [vmem:[%s824_s17 + $0x18] ss:$12 sps:$4 sm:$0xff]   ;;  %v739_v26 = vld [vmem:[%s824_s17 + $0x34] ss:$12 sps:$4 sm:$0xff]   ;;  %v741_v27 = vld [vmem:[%s824_s17 + $0x30] ss:$12 sps:$4 sm:$0xff]  }
  0x14   : > { %655 = vmatprep.subr.bf16.mxu0 %v721_v9 }
  0x17   : > { %656 = vmatpush3.bf16.msra.mxu0 %v722_v11 }
  0x18   : > { %657 = vmatprep.subr.bf16.mxu0 %v723_v12 }
  0x1a   : > { %695 = vmatmul.mubr.msk.bf16.gmra.mrb[4].mxu1 %vm383_vm1, %v738_v21 }
  0x1b   : > { %658 = vmatpush3.bf16.msra.mxu0 %v724_v13  ;;  %698 = vmatprep.mubr.msk.bf16.mxu1 %vm752_vm0, %v751_v2 }
  0x1c   : > { %659 = vmatprep.subr.bf16.mxu0 %v725_v15 }
  0x1f   : > { %660 = vmatpush3.bf16.msra.mxu0 %v726_v18 }
  0x20   : > { %661 = vmatprep.subr.bf16.mxu0 %v728_v19 }
  0x22   : > { %699 = vmatmul.mubr.msk.bf16.gmra.mrb[8].mxu1 %vm383_vm1, %v742_v24 }
  0x23   : > { %662 = vmatpush3.bf16.msra.mxu0 %v729_v20 }
  0x26   : > { %426 = vmatmul.mubr.bf16.vlgmr.msra.gmra.mrb[0].mxu0 %v731_v22 }
  0x27   : > { %433 = vmatprep.mubr.bf16.mxu0 %v735_v23 }
  0x2e   : > { %434 = vmatmul.mubr.bf16.gmra.mrb[4].mxu0 %v737_v25 }
  0x2f   : > { %441 = vmatprep.mubr.bf16.mxu0 %v739_v26 }
  0x36   : > { %442 = vmatmul.mubr.bf16.gmra.mrb[8].mxu0 %v741_v27 }
  0xe5   : > { %v484_v28 = vpop.f32.mrb[0].mxu1 }
  0xe6   : > { %v692_v29 = vpop.f32.mrb[1].mxu1 }
  0xe7   : > { %v487_v30 = vpop.f32.mrb[2].mxu1 }
  0xe8   : > { %v693_v31 = vpop.f32.mrb[3].mxu1 }
  0xed   : > { %v492_v32 = vpop.f32.mrb[4].mxu1 }
  0xee   : > { %v696_v33 = vpop.f32.mrb[5].mxu1 }
  0xef   : > { %v495_v34 = vpop.f32.mrb[6].mxu1 }
  0xf0   : > { %v697_v36 = vpop.f32.mrb[7].mxu1 }
  0xf5   : > { %v500_v43 = vpop.f32.mrb[8].mxu1 }
  0xf6   : > { %v700_v45 = vpop.f32.mrb[9].mxu1 }
  0xf7   : > { %v503_v46 = vpop.f32.mrb[10].mxu1 }
  0xf8   : > { %v701_v51 = vpop.f32.mrb[11].mxu1 }
  0xf9   : > { %v663_v35 = vpop.f32.mrb[0].mxu0 }
  0xfa   : > { %v664_v37 = vpop.f32.mrb[1].mxu0 }
  0xfb   : > { %v665_v38 = vadd.f32 %v664_v37, %v663_v35  ;;  %v666_v39 = vpop.f32.mrb[2].mxu0 }
  0xfc   : > { %v667_v40 = vpop.f32.mrb[3].mxu0 }
  0xfd   : > { %v485_v41 = vadd.f32 %v665_v38, %v484_v28  ;;  %v668_v42 = vadd.f32 %v667_v40, %v666_v39 }
  0xff   : > { %v488_v44 = vadd.f32 %v668_v42, %v487_v30  ;;  %v519_v47 = vmul.f32 %v485_v41, %v485_v41 }
 0x101   : > { %v507_v48 = vadd.f32 %v488_v44, %v485_v41  ;;  %v520_v49 = vmul.f32 %v488_v44, %v488_v44  ;;  %v669_v50 = vpop.f32.mrb[4].mxu0 }
 0x102   : > { %v670_v52 = vpop.f32.mrb[5].mxu0 }
 0x103   : > { %v525_v53 = vadd.f32 %v520_v49, %v519_v47  ;;  %v671_v54 = vadd.f32 %v670_v52, %v669_v50  ;;  %v672_v55 = vpop.f32.mrb[6].mxu0 }
 0x104   : > { %v673_v56 = vpop.f32.mrb[7].mxu0 }
 0x105   : > { %v493_v57 = vadd.f32 %v671_v54, %v492_v32  ;;  %v674_v58 = vadd.f32 %v673_v56, %v672_v55 }
 0x107   : > { %v508_v59 = vadd.f32 %v507_v48, %v493_v57  ;;  %v521_v60 = vmul.f32 %v493_v57, %v493_v57  ;;  %v496_v61 = vadd.f32 %v674_v58, %v495_v34 }
 0x109   : > { %v526_v62 = vadd.f32 %v525_v53, %v521_v60  ;;  %v509_v63 = vadd.f32 %v508_v59, %v496_v61  ;;  %v522_v0 = vmul.f32 %v496_v61, %v496_v61  ;;  %v675_v1 = vpop.f32.mrb[8].mxu0 }
 0x10a   : > { %v676_v2 = vpop.f32.mrb[9].mxu0 }
 0x10b   : > { %v527_v3 = vadd.f32 %v526_v62, %v522_v0  ;;  %v677_v4 = vadd.f32 %v676_v2, %v675_v1  ;;  %v678_v5 = vpop.f32.mrb[10].mxu0 }
 0x10c   : > { %v679_v6 = vpop.f32.mrb[11].mxu0 }
 0x10d   : > { %v501_v7 = vadd.f32 %v677_v4, %v500_v43  ;;  %v680_v8 = vadd.f32 %v679_v6, %v678_v5 }
 0x10f   : > { %v510_v9 = vadd.f32 %v509_v63, %v501_v7  ;;  %v523_v10 = vmul.f32 %v501_v7, %v501_v7  ;;  %v504_v11 = vadd.f32 %v680_v8, %v503_v46 }
 0x111   : > { %v528_v12 = vadd.f32 %v527_v3, %v523_v10  ;;  %v511_v13 = vadd.f32 %v510_v9, %v504_v11  ;;  %v524_v14 = vmul.f32 %v504_v11, %v504_v11 }
 0x113   : > { %v512_v15 = vrot.slane %v511_v13, 4  ;;  %v529_v16 = vadd.f32 %v528_v12, %v524_v14 }
 0x115   : > { %v513_v17 = vadd.f32 %v512_v15, %v511_v13  ;;  %v530_v18 = vrot.slane %v529_v16, 4 }
 0x117   : > { %v514_v19 = vrot.slane %v513_v17, 2  ;;  %v531_v20 = vadd.f32 %v530_v18, %v529_v16 }
 0x119   : > { %v515_v21 = vadd.f32 %v514_v19, %v513_v17  ;;  %v532_v22 = vrot.slane %v531_v20, 2 }
 0x11b   : > { %v516_v23 = vrot.slane %v515_v21, 1  ;;  %v533_v24 = vadd.f32 %v532_v22, %v531_v20 }
 0x11d   : > { %v517_v25 = vadd.f32 %v516_v23, %v515_v21  ;;  %v534_v26 = vrot.slane %v533_v24, 1 }
 0x11f   : > { %518 = vst [vmem:[%s177_s5] sm:$0x1] %v517_v25  ;;  %v535_v27 = vadd.f32 %v534_v26, %v533_v24 }
 0x121   : > { %536 = vst [vmem:[%s180_s8] sm:$0x1] %v535_v27 }
 0x122 PF: > { %s14_s12 = sadd.s32 1, %s749_s12  }
 0x123   : > { %p11_p5 = scmp.ge.s32.totalorder %s14_s12, 4  }
 0x125   :  { %13 = sbr.rel (!%p11_p5) target bundleno = 1 (0x1), region = 70 }

// kernel: fvtr_embedding_forward.7
= control target key start
LH: loop header
LB: loop body
LE: loop exit
PB: predicated region body
PF: predicated region fallthrough
CT: control target
= control target key end

     0   :  { %s900_s18 = smov 0   ;;  %s1024_s0 = inlined_call_operand.vmem [shape: bf16[96,288], index: 0, kind: input, shape index: {}]   ;;  %s1025_s1 = inlined_call_operand.vmem [shape: bf16[288,128], index: 1, kind: input, shape index: {}]   ;;  %s1026_s2 = inlined_call_operand.vmem [shape: f32[1,128], index: 2, kind: input, shape index: {}]   ;;  %s1027_s3 = inlined_call_operand.vmem [shape: f32[1,128], index: 3, kind: input, shape index: {}]   ;;  %s1028_s4 = inlined_call_operand.vmem [shape: f32[48,128], index: 4, kind: input, shape index: {}]   ;;  %s1029_s5 = inlined_call_operand.vmem [shape: f32[96,128], index: 5, kind: output, shape index: {}]  }
   0x1 LB: > { %s711_s19 = sadd.s32 4294967295, %s866_s18   ;;  %p715_p0 = scmp.ge.s32.totalorder %s866_s18, 1  ;;  %s866_s18 = sphi %s900_s18, %s15_s18  }
   0x2   : > { %p189_p1 = scmp.lt.s32.totalorder %s866_s18, 3 }
   0x4   : > { %p190_p2 = pnand %p715_p0, %p189_p1 }
   0x5   : > { %v818_v0 = vld [vmem:[%s1025_s1 + $0x40] sm:$0xff] (!%p190_p2)   ;;  %v868_v2 = vmov (!%p190_p2), 0.0   ;;  %s218_s24 = smul.u32 (!%p190_p2), 6, %s711_s19  ;;  %v820_v3 = vld [vmem:[%s1025_s1 + $0x48] sm:$0xff] (!%p190_p2)   ;;  %vm869_vm0 = vmmov (!%p190_p2), 0   ;;  %v822_v5 = vld [vmem:[%s1025_s1 + $0x50] sm:$0xff] (!%p190_p2)  }
   0x6   : > { %193 = sbr.rel (%p190_p2) target bundleno = 305 (0x131), region = 40  ;;  %v819_v1 = vld [vmem:[%s1025_s1] sm:$0xff] (!%p190_p2)   ;;  %791 = vmatprep.subr.bf16.mxu1 (!%p190_p2), %v868_v2  ;;  %752 = vmatprep.subr.bf16.mxu0 (!%p190_p2), %v818_v0  ;;  %v821_v4 = vld [vmem:[%s1025_s1 + $0x8] sm:$0xff] (!%p190_p2)   ;;  %v823_v6 = vld [vmem:[%s1025_s1 + $0x10] sm:$0xff] (!%p190_p2)   ;;  %vm433_vm1 = vcmask (!%p190_p2), 261120  }
   0x7   : > { %753 = vmatpush3.bf16.msra.mxu0 (!%p190_p2), %v819_v1  ;;  %795 = vmatprep.mubr.msk.bf16.mxu1 (!%p190_p2), %vm869_vm0, %v868_v2  ;;  %p219_p3 = scmp.lt.s32.totalorder (!%p190_p2), %s218_s24, 11  ;;  %v824_v7 = vld [vmem:[%s1025_s1 + $0x58] sm:$0xff] (!%p190_p2)   ;;  %v826_v9 = vld [vmem:[%s1025_s1 + $0x60] sm:$0xff] (!%p190_p2)   ;;  %v828_v12 = vld [vmem:[%s1025_s1 + $0x68] sm:$0xff] (!%p190_p2)  }
   0x8   : > { %754 = vmatprep.subr.bf16.mxu0 (!%p190_p2), %v820_v3  ;;  %v825_v8 = vld [vmem:[%s1025_s1 + $0x18] sm:$0xff] (!%p190_p2)   ;;  %v832_v10 = vld [vmem:[%s1025_s1 + $0x80] sm:$0xff] (!%p190_p2)   ;;  %v829_v13 = vld [vmem:[%s1025_s1 + $0x28] sm:$0xff] (!%p190_p2)  }
   0x9   : > { %v827_v11 = vld [vmem:[%s1025_s1 + $0x20] sm:$0xff] (!%p190_p2)   ;;  %792 = vmatpush3.bf16.msra.mxu1 (!%p190_p2), %v832_v10  ;;  %v835_v14 = vld [vmem:[%s1025_s1 + $0x88] sm:$0xff] (!%p190_p2)   ;;  %v830_v15 = vld [vmem:[%s1025_s1 + $0x70] sm:$0xff] (!%p190_p2)  }
   0xa   : > { %793 = vmatprep.subr.bf16.mxu1 (!%p190_p2), %v868_v2  ;;  %v831_v18 = vld [vmem:[%s1025_s1 + $0x30] sm:$0xff] (!%p190_p2)   ;;  %v833_v19 = vld [vmem:[%s1025_s1 + $0x78] sm:$0xff] (!%p190_p2)   ;;  %v748_v40 = vld [vmem:[%s1026_s2] ss:$0 sm:$0xff] (!%p190_p2) }
   0xb   : > { %755 = vmatpush3.bf16.msra.mxu0 (!%p190_p2), %v821_v4  ;;  %v834_v20 = vld [vmem:[%s1025_s1 + $0x38] sm:$0xff] (!%p190_p2)   ;;  %v749_v44 = vld [vmem:[%s1027_s3] ss:$0 sm:$0xff] (!%p190_p2) }
   0xc   : > { %756 = vmatprep.subr.bf16.mxu0 (!%p190_p2), %v822_v5 }
   0xd   : > { %s1031_s24 = smov (!%p219_p3, %s218_s24), 11  ;;  %794 = vmatpush3.bf16.msra.mxu1 %v835_v14 }
   0xe   : > { %s807_s14 = smul.u32 12, %s1031_s24  ;;  %s717_s17 = sshll.u32 %s1031_s24, 3 }
   0xf   : > { %757 = vmatpush3.bf16.msra.mxu0 %v823_v6  ;;  %s998_s23 = scalar_lea.vmem %s1029_s5, %s717_s17 }
  0x10   : > { %758 = vmatprep.subr.bf16.mxu0 %v824_v7  ;;  %s951_s25 = scalar_lea.vmem %s1024_s0, %s807_s14 }
  0x11   : > { %v838_v16 = vld [vmem:[%s951_s25 + $0x4] ss:$12 sps:$4 sm:$0xff]   ;;  %v839_v17 = vld [vmem:[%s951_s25 + $0x8] ss:$12 sps:$4 sm:$0xff]   ;;  %v843_v21 = vld [vmem:[%s951_s25 + $0x20] ss:$12 sps:$4 sm:$0xff]  }
  0x12   : > { %475 = vmatprep.mubr.bf16.mxu0 %v838_v16  ;;  %796 = vmatmul.mubr.msk.bf16.vlgmr.msra.gmra.mrb[0].mxu1 %vm433_vm1, %v839_v17  ;;  %v836_v22 = vld [vmem:[%s951_s25] ss:$12 sps:$4 sm:$0xff]   ;;  %v840_v23 = vld [vmem:[%s951_s25 + $0x1c] ss:$12 sps:$4 sm:$0xff]   ;;  %v847_v24 = vld [vmem:[%s951_s25 + $0x38] ss:$12 sps:$4 sm:$0xff]  }
  0x13   : > { %759 = vmatpush3.bf16.msra.mxu0 %v825_v8  ;;  %799 = vmatprep.mubr.msk.bf16.mxu1 %vm869_vm0, %v868_v2  ;;  %v842_v25 = vld [vmem:[%s951_s25 + $0x18] ss:$12 sps:$4 sm:$0xff]   ;;  %v844_v26 = vld [vmem:[%s951_s25 + $0x34] ss:$12 sps:$4 sm:$0xff]   ;;  %v846_v27 = vld [vmem:[%s951_s25 + $0x30] ss:$12 sps:$4 sm:$0xff]  }
  0x14   : > { %760 = vmatprep.subr.bf16.mxu0 %v826_v9 }
  0x17   : > { %761 = vmatpush3.bf16.msra.mxu0 %v827_v11 }
  0x18   : > { %762 = vmatprep.subr.bf16.mxu0 %v828_v12 }
  0x1a   : > { %800 = vmatmul.mubr.msk.bf16.gmra.mrb[4].mxu1 %vm433_vm1, %v843_v21 }
  0x1b   : > { %763 = vmatpush3.bf16.msra.mxu0 %v829_v13  ;;  %803 = vmatprep.mubr.msk.bf16.mxu1 %vm869_vm0, %v868_v2 }
  0x1c   : > { %764 = vmatprep.subr.bf16.mxu0 %v830_v15 }
  0x1f   : > { %765 = vmatpush3.bf16.msra.mxu0 %v831_v18 }
  0x20   : > { %766 = vmatprep.subr.bf16.mxu0 %v833_v19 }
  0x22   : > { %804 = vmatmul.mubr.msk.bf16.gmra.mrb[8].mxu1 %vm433_vm1, %v847_v24 }
  0x23   : > { %767 = vmatpush3.bf16.msra.mxu0 %v834_v20 }
  0x26   : > { %476 = vmatmul.mubr.bf16.vlgmr.msra.gmra.mrb[0].mxu0 %v836_v22 }
  0x27   : > { %483 = vmatprep.mubr.bf16.mxu0 %v840_v23 }
  0x2e   : > { %484 = vmatmul.mubr.bf16.gmra.mrb[4].mxu0 %v842_v25 }
  0x2f   : > { %491 = vmatprep.mubr.bf16.mxu0 %v844_v26 }
  0x36   : > { %492 = vmatmul.mubr.bf16.gmra.mrb[8].mxu0 %v846_v27 }
  0xe5   : > { %v534_v28 = vpop.f32.mrb[0].mxu1 }
  0xe6   : > { %v797_v29 = vpop.f32.mrb[1].mxu1 }
  0xe7   : > { %v537_v30 = vpop.f32.mrb[2].mxu1 }
  0xe8   : > { %v798_v31 = vpop.f32.mrb[3].mxu1 }
  0xed   : > { %v542_v32 = vpop.f32.mrb[4].mxu1 }
  0xee   : > { %v801_v33 = vpop.f32.mrb[5].mxu1 }
  0xef   : > { %v545_v34 = vpop.f32.mrb[6].mxu1 }
  0xf0   : > { %v802_v36 = vpop.f32.mrb[7].mxu1 }
  0xf5   : > { %v550_v45 = vpop.f32.mrb[8].mxu1 }
  0xf6   : > { %v805_v48 = vpop.f32.mrb[9].mxu1 }
  0xf7   : > { %v553_v49 = vpop.f32.mrb[10].mxu1 }
  0xf8   : > { %v806_v53 = vpop.f32.mrb[11].mxu1 }
  0xf9   : > { %v768_v35 = vpop.f32.mrb[0].mxu0 }
  0xfa   : > { %v769_v37 = vpop.f32.mrb[1].mxu0 }
  0xfb   : > { %v770_v38 = vadd.f32 %v769_v37, %v768_v35  ;;  %v771_v39 = vpop.f32.mrb[2].mxu0 }
  0xfc   : > { %v772_v41 = vpop.f32.mrb[3].mxu0 }
  0xfd   : > { %v535_v42 = vadd.f32 %v770_v38, %v534_v28  ;;  %v773_v43 = vadd.f32 %v772_v41, %v771_v39 }
  0xff   : > { %v564_v46 = vmul.f32 %v748_v40, %v535_v42  ;;  %v538_v47 = vadd.f32 %v773_v43, %v537_v30 }
 0x101   : > { %v577_v50 = vadd.f32 %v749_v44, %v564_v46  ;;  %v565_v51 = vmul.f32 %v748_v40, %v538_v47  ;;  %v774_v52 = vpop.f32.mrb[4].mxu0 }
 0x102   : > { %v775_v54 = vpop.f32.mrb[5].mxu0 }
 0x103   : > { %v589_v55 = vmul.f32 0.044715, %v577_v50  ;;  %v578_v56 = vadd.f32 %v749_v44, %v565_v51  ;;  %v776_v57 = vadd.f32 %v775_v54, %v774_v52  ;;  %v777_v58 = vpop.f32.mrb[6].mxu0  ;;  %v583_v39 = vmul.f32 0.5, %v577_v50 }
 0x104   : > { %v778_v59 = vpop.f32.mrb[7].mxu0 }
 0x105   : > { %v595_v60 = vmul.f32 %v589_v55, %v577_v50  ;;  %v590_v61 = vmul.f32 0.044715, %v578_v56  ;;  %v543_v62 = vadd.f32 %v776_v57, %v542_v32  ;;  %v779_v63 = vadd.f32 %v778_v59, %v777_v58  ;;  %v639_v59 = vld [vmem:[%s1028_s4 + $0x10] sm:$0xff] }
 0x106   : > { %v584_v46 = vmul.f32 0.5, %v578_v56 }
 0x107   : > { %v601_v0 = vmul.f32 %v595_v60, %v577_v50  ;;  %v596_v1 = vmul.f32 %v590_v61, %v578_v56  ;;  %v566_v2 = vmul.f32 %v748_v40, %v543_v62  ;;  %v546_v3 = vadd.f32 %v779_v63, %v545_v34 }
 0x109   : > { %v607_v4 = vadd.f32 %v601_v0, %v577_v50  ;;  %v602_v5 = vmul.f32 %v596_v1, %v578_v56  ;;  %v579_v6 = vadd.f32 %v749_v44, %v566_v2  ;;  %v780_v7 = vpop.f32.mrb[8].mxu0  ;;  %v567_v8 = vmul.f32 %v748_v40, %v546_v3  ;;  %v640_v1 = vld [vmem:[%s1028_s4 + $0x18] sm:$0xff] }
 0x10a   : > { %v781_v9 = vpop.f32.mrb[9].mxu0 }
 0x10b   : > { %v613_v10 = vmul.f32 0.7978846, %v607_v4  ;;  %v608_v11 = vadd.f32 %v602_v5, %v578_v56  ;;  %v591_v12 = vmul.f32 0.044715, %v579_v6  ;;  %v783_v13 = vpop.f32.mrb[10].mxu0  ;;  %v580_v14 = vadd.f32 %v749_v44, %v567_v8  ;;  %v641_v8 = vld [vmem:[%s1028_s4 + $0x20] sm:$0xff] }
 0x10c   : > { %v782_v15 = vadd.f32 %v781_v9, %v780_v7  ;;  %v784_v16 = vpop.f32.mrb[11].mxu0  ;;  %v585_v57 = vmul.f32 0.5, %v579_v6 }
 0x10d   : > { %848 = vtanh.f32 %v613_v10  ;;  %v614_v17 = vmul.f32 0.7978846, %v608_v11  ;;  %v597_v18 = vmul.f32 %v591_v12, %v579_v6  ;;  %v785_v19 = vadd.f32 %v784_v16, %v783_v13  ;;  %v642_v12 = vld [vmem:[%s1028_s4 + $0x28] sm:$0xff] }
 0x10e   : > { %v592_v20 = vmul.f32 0.044715, %v580_v14  ;;  %v551_v21 = vadd.f32 %v782_v15, %v550_v45  ;;  %v586_v62 = vmul.f32 0.5, %v580_v14 }
 0x10f   : > { %850 = vtanh.f32 %v614_v17  ;;  %v603_v22 = vmul.f32 %v597_v18, %v579_v6  ;;  %v554_v23 = vadd.f32 %v785_v19, %v553_v49  ;;  %v638_v49 = vld [vmem:[%s1028_s4 + $0x8] sm:$0xff] }
 0x110   : > { %v598_v24 = vmul.f32 %v592_v20, %v580_v14  ;;  %v568_v25 = vmul.f32 %v748_v40, %v551_v21 }
 0x111   : > { %v609_v26 = vadd.f32 %v603_v22, %v579_v6  ;;  %v569_v27 = vmul.f32 %v748_v40, %v554_v23  ;;  %v637_v40 = vld [vmem:[%s1028_s4] sm:$0xff] }
 0x112   : > { %v604_v28 = vmul.f32 %v598_v24, %v580_v14  ;;  %v581_v29 = vadd.f32 %v749_v44, %v568_v25 }
 0x113   : > { %v615_v30 = vmul.f32 0.7978846, %v609_v26  ;;  %v582_v31 = vadd.f32 %v749_v44, %v569_v27 }
 0x114   : > { %v610_v32 = vadd.f32 %v604_v28, %v580_v14  ;;  %v593_v33 = vmul.f32 0.044715, %v581_v29  ;;  %v587_v6 = vmul.f32 0.5, %v581_v29 }
 0x115   : > { %852 = vtanh.f32 %v615_v30  ;;  %v594_v34 = vmul.f32 0.044715, %v582_v31  ;;  %v588_v9 = vmul.f32 0.5, %v582_v31 }
 0x116   : > { %v616_v35 = vmul.f32 0.7978846, %v610_v32  ;;  %v599_v36 = vmul.f32 %v593_v33, %v581_v29 }
 0x117   : > { %v849_v37 = vpop.eup %848  ;;  %v600_v38 = vmul.f32 %v594_v34, %v582_v31 }
 0x118   : > { %v625_v41 = vadd.f32 1.0, %v849_v37  ;;  %854 = vtanh.f32 %v616_v35  ;;  %v605_v42 = vmul.f32 %v599_v36, %v581_v29 }
 0x119   : > { %v851_v43 = vpop.eup %850  ;;  %v606_v45 = vmul.f32 %v600_v38, %v582_v31 }
 0x11a   : > { %v631_v44 = vmul.f32 %v625_v41, %v583_v39  ;;  %v626_v47 = vadd.f32 1.0, %v851_v43  ;;  %v611_v48 = vadd.f32 %v605_v42, %v581_v29 }
 0x11b   : > { %v612_v50 = vadd.f32 %v606_v45, %v582_v31 }
 0x11c   : > { %v643_v51 = vadd.f32 %v637_v40, %v631_v44  ;;  %v632_v52 = vmul.f32 %v626_v47, %v584_v46  ;;  %v617_v53 = vmul.f32 0.7978846, %v611_v48 }
 0x11d   : > { %v618_v54 = vmul.f32 0.7978846, %v612_v50 }
 0x11e   : > { %649 = vst [vmem:[%s998_s23] sm:$0xff] %v643_v51  ;;  %v644_v55 = vadd.f32 %v638_v49, %v632_v52  ;;  %856 = vtanh.f32 %v617_v53 }
 0x11f   : > { %v853_v56 = vpop.eup %852  ;;  %858 = vtanh.f32 %v618_v54 }
 0x120   : > { %650 = vst [vmem:[%s998_s23 + $0x8] sm:$0xff] %v644_v55  ;;  %v627_v58 = vadd.f32 1.0, %v853_v56 }
 0x122   : > { %v855_v60 = vpop.eup %854  ;;  %v633_v61 = vmul.f32 %v627_v58, %v585_v57 }
 0x123   : > { %v628_v63 = vadd.f32 1.0, %v855_v60 }
 0x124   : > { %v645_v0 = vadd.f32 %v639_v59, %v633_v61 }
 0x125   : > { %v634_v2 = vmul.f32 %v628_v63, %v586_v62 }
 0x126   : > { %651 = vst [vmem:[%s998_s23 + $0x10] sm:$0xff] %v645_v0 }
 0x127   : > { %v646_v3 = vadd.f32 %v640_v1, %v634_v2 }
 0x128   : > { %v857_v4 = vpop.eup %856 }
 0x129   : > { %v859_v5 = vpop.eup %858  ;;  %652 = vst [vmem:[%s998_s23 + $0x18] sm:$0xff] %v646_v3  ;;  %v629_v7 = vadd.f32 1.0, %v857_v4 }
 0x12a   : > { %v630_v10 = vadd.f32 1.0, %v859_v5 }
 0x12b   : > { %v635_v11 = vmul.f32 %v629_v7, %v587_v6 }
 0x12c   : > { %v636_v13 = vmul.f32 %v630_v10, %v588_v9 }
 0x12d   : > { %v647_v14 = vadd.f32 %v641_v8, %v635_v11 }
 0x12e   : > { %v648_v15 = vadd.f32 %v642_v12, %v636_v13 }
 0x12f   : > { %653 = vst [vmem:[%s998_s23 + $0x20] sm:$0xff] %v647_v14 }
 0x130   : > { %654 = vst [vmem:[%s998_s23 + $0x28] sm:$0xff] %v648_v15 }
 0x131 PF: > { %s15_s18 = sadd.s32 1, %s866_s18  }
 0x132   : > { %p12_p4 = scmp.ge.s32.totalorder %s15_s18, 4  }
 0x134   :  { %14 = sbr.rel (!%p12_p4) target bundleno = 1 (0x1), region = 70 }

</bundles_post_ra>
